<compile_context>
chip_gen: v5e
topology: v5e:2x2
jax: 0.10.0
libtpu: 0.0.40
codegen_flags: <defaults>
</compile_context>

<pallas_src>
import functools

import jax
import jax.numpy as jnp
from jax import lax
from jax.experimental import pallas as pl
from jax.experimental.pallas import tpu as pltpu

# bf16 operands on a real TPU (MXU); f32 operands elsewhere (CPU/interpret backends
# do not support BF16 x BF16 = F32 dots).
_ON_TPU = jax.default_backend() == "tpu"
_DOT_DTYPE = jnp.bfloat16 if _ON_TPU else jnp.float32


def _mm(a, b):
    """2-D matmul with f32 accumulation; operand dtype follows the weight."""
    return jnp.dot(a.astype(b.dtype), b, preferred_element_type=jnp.float32)


def _einsum(eq, a, b):
    return jnp.einsum(eq, a.astype(_DOT_DTYPE), b.astype(_DOT_DTYPE),
                      preferred_element_type=jnp.float32)


def _vmem_limit_bytes():
    """Generation-aware scoped-VMEM limit (v5e/v6e: ~100 MiB, v7x: ~51 MiB)."""
    try:
        cap = pltpu.get_tpu_info().vmem_capacity_bytes
    except Exception:
        cap = 64 * 1024 * 1024
    return min(int(cap * 0.8), 100 * 1024 * 1024)


def _pick_tile(n, pref):
    """Largest divisor of n that is <= pref."""
    t = min(pref, n)
    while n % t:
        t -= 1
    return t


# ----------------------------------------------------------------- BiLSTM ----
def _bilstm_kernel(tmax_ref,                               # scalar prefetch (SMEM)
                   gx_f_ref, gx_b_ref, len_ref,            # inputs
                   whh_f_ref, whh_b_ref,
                   out_f_ref, out_b_ref,                   # outputs (time-major chunk)
                   h_f_ref, c_f_ref, h_b_ref, c_b_ref,     # VMEM carry scratch
                   *, hidden, chunk):
    """Variable-length BiLSTM recurrence over one (batch-tile, time-chunk) block.

    gx_*_ref : (tc, tb, 4H) bf16  precomputed input projections (x @ W_ih + b)
    out_*_ref: (tc, tb, H)  f32   hidden states; padded steps are zero.
    h/c refs : (tb, H)      f32   state carried across the chunk grid axis.
    """
    H = hidden
    c_idx = pl.program_id(1)
    n_chunks = pl.num_programs(1)

    @pl.when(c_idx == 0)
    def _():
        zeros = jnp.zeros(h_f_ref.shape, h_f_ref.dtype)
        h_f_ref[...] = zeros
        c_f_ref[...] = zeros
        h_b_ref[...] = zeros
        c_b_ref[...] = zeros

    tile_max = tmax_ref[pl.program_id(0)]          # per-tile max length (early exit)
    t0_f = c_idx * chunk                           # absolute start time, forward chunk
    t0_b = (n_chunks - 1 - c_idx) * chunk          # absolute start time, backward chunk
    fwd_active = tile_max > t0_f
    bwd_active = tile_max > t0_b
    any_active = jnp.logical_or(fwd_active, bwd_active)

    @pl.when(any_active)
    def _():
        lens = len_ref[...]                        # (tb, 1) int32
        whh_f = whh_f_ref[...]                     # (H, 4H)
        whh_b = whh_b_ref[...]

        def lstm_gates(g, c):
            # torch LSTM gate order: i, f, g, o
            i = jax.nn.sigmoid(g[:, 0 * H:1 * H])
            f = jax.nn.sigmoid(g[:, 1 * H:2 * H])
            gg = jnp.tanh(g[:, 2 * H:3 * H])
            o = jax.nn.sigmoid(g[:, 3 * H:4 * H])
            c_new = f * c + i * gg
            return o * jnp.tanh(c_new), c_new

        def body(i, carry):
            h_f, c_f, h_b, c_b = carry
            t = t0_f + i                           # forward absolute time
            lb = chunk - 1 - i                     # backward local index (descending)
            t_b = t0_b + lb                        # backward absolute time

            # Two independent recurrences interleaved: each chain's small recurrent
            # matmul / transcendentals hide behind the other's.
            g_f = gx_f_ref[i].astype(jnp.float32) + _mm(h_f, whh_f)
            g_b = gx_b_ref[lb].astype(jnp.float32) + _mm(h_b, whh_b)
            hf_new, cf_new = lstm_gates(g_f, c_f)
            hb_new, cb_new = lstm_gates(g_b, c_b)

            m_f = lens > t                         # (tb, 1): valid timestep?
            m_b = lens > t_b
            h_f = jnp.where(m_f, hf_new, h_f)
            c_f = jnp.where(m_f, cf_new, c_f)
            h_b = jnp.where(m_b, hb_new, h_b)
            c_b = jnp.where(m_b, cb_new, c_b)

            # Each output step written exactly once (zero when padded).
            out_f_ref[i] = jnp.where(m_f, hf_new, 0.0)
            out_b_ref[lb] = jnp.where(m_b, hb_new, 0.0)
            return h_f, c_f, h_b, c_b

        carry = lax.fori_loop(
            0, chunk, body,
            (h_f_ref[...], c_f_ref[...], h_b_ref[...], c_b_ref[...]))
        h_f_ref[...], c_f_ref[...], h_b_ref[...], c_b_ref[...] = carry

    @pl.when(jnp.logical_not(any_active))
    def _():
        # Chunk entirely beyond this tile's max length for both directions:
        # skip all recurrence work, just emit zeros (single bulk store).
        out_f_ref[...] = jnp.zeros(out_f_ref.shape, out_f_ref.dtype)
        out_b_ref[...] = jnp.zeros(out_b_ref.shape, out_b_ref.dtype)


def bilstm(x, lengths, lstm_params, hidden, *, batch_tile=128, time_chunk=64,
           vmem_limit_bytes=None):
    """Bidirectional LSTM with per-example lengths (pack_padded semantics).

    Returns (out_f, out_b), each time-major (T, B, hidden), padded steps zero.
    """
    B, T, _ = x.shape
    H = hidden
    wih_f, whh_f, b_f, wih_b, whh_b, b_b = lstm_params
    if vmem_limit_bytes is None:
        vmem_limit_bytes = _vmem_limit_bytes()

    tb = _pick_tile(B, batch_tile)
    tc = _pick_tile(T, time_chunk)
    n_tiles, n_chunks = B // tb, T // tc

    # Hoisted input projection: one large MXU-friendly matmul per direction,
    # time-major output, stored in bf16 (halves HBM->VMEM DMA of the gx stream).
    gx_f = (_einsum('bte,eg->tbg', x, wih_f) + b_f[None]).astype(jnp.bfloat16)
    gx_b = (_einsum('bte,eg->tbg', x, wih_b) + b_b[None]).astype(jnp.bfloat16)

    # Per-tile max length (scalar prefetch) bounds each tile's serial work.
    tile_max = jnp.max(lengths.reshape(n_tiles, tb), axis=1).astype(jnp.int32)

    grid_spec = pltpu.PrefetchScalarGridSpec(
        num_scalar_prefetch=1,
        grid=(n_tiles, n_chunks),
        in_specs=[
            pl.BlockSpec((tc, tb, 4 * H), lambda b, c, tm: (c, b, 0)),              # gx_f
            pl.BlockSpec((tc, tb, 4 * H), lambda b, c, tm: (n_chunks - 1 - c, b, 0)),  # gx_b (reversed chunks)
            pl.BlockSpec((tb, 1), lambda b, c, tm: (b, 0)),                         # lengths
            pl.BlockSpec((H, 4 * H), lambda b, c, tm: (0, 0)),                      # whh_f
            pl.BlockSpec((H, 4 * H), lambda b, c, tm: (0, 0)),                      # whh_b
        ],
        out_specs=(
            pl.BlockSpec((tc, tb, H), lambda b, c, tm: (c, b, 0)),
            pl.BlockSpec((tc, tb, H), lambda b, c, tm: (n_chunks - 1 - c, b, 0)),
        ),
        scratch_shapes=[pltpu.VMEM((tb, H), jnp.float32) for _ in range(4)],
    )
    out_f, out_b = pl.pallas_call(
        functools.partial(_bilstm_kernel, hidden=H, chunk=tc),
        out_shape=(jax.ShapeDtypeStruct((T, B, H), jnp.float32),
                   jax.ShapeDtypeStruct((T, B, H), jnp.float32)),
        grid_spec=grid_spec,
        compiler_params=pltpu.CompilerParams(
            dimension_semantics=("parallel", "arbitrary"),
            vmem_limit_bytes=vmem_limit_bytes),
    )(tile_max, gx_f, gx_b, lengths,
      whh_f.astype(_DOT_DTYPE), whh_b.astype(_DOT_DTYPE))
    return out_f, out_b


# --------------------------------------------------- attention hops + GRU ----
def _ram_hops_kernel(kx_ref, s1_ref, et0_ref,
                     wq_ref, bq_ref, w2_ref,
                     wcg_ref, bcg_ref, ghh_ref, bhh_ref,
                     out_ref, *, hops):
    TB, T, D = kx_ref.shape
    kx = kx_ref[...].astype(jnp.float32)      # (TB, T, D) = W_k(memory)
    s1 = s1_ref[...]                          # (TB, T) f32: kx . w[:D] (hop-invariant)
    et = et0_ref[...]                         # (TB, D) f32: mean-pooled aspect
    wq = wq_ref[...]; bq = bq_ref[...]
    w2 = w2_ref[...]                          # (1, D) f32
    wcg = wcg_ref[...]; bcg = bcg_ref[...]    # attn proj folded into GRU W_ih
    ghh = ghh_ref[...]; bhh = bhh_ref[...]

    for _ in range(hops):                     # hops is small & static -> unroll
        # Attention, score_function='mlp', n_head=1, q_len=1 (attends over padded
        # positions too, exactly like the PyTorch reference).
        qx = _mm(et, wq) + bq                                          # (TB, D)
        s2 = jnp.sum(qx * w2, axis=-1, keepdims=True)                  # (TB, 1)
        score = jnp.tanh(s1 + s2)                                      # (TB, T)
        score = score - jnp.max(score, axis=-1, keepdims=True)
        e = jnp.exp(score)
        alpha = e / jnp.sum(e, axis=-1, keepdims=True)                 # softmax over T
        # context = sum_t alpha_t * kx_t on the VPU/XLU (multiply + sublane reduce);
        # avoids the pathological M=1 batched MXU matmul.
        ctx = jnp.sum(alpha[:, :, None] * kx, axis=1)                  # (TB, D)

        # torch.nn.GRUCell (gate order r, z, n); attention proj (dropout p=0) is
        # folded into W_ih so only two D x 3D matmuls remain per hop.
        gi = _mm(ctx, wcg) + bcg                                       # (TB, 3D)
        gh = _mm(et, ghh) + bhh                                        # (TB, 3D)
        r = jax.nn.sigmoid(gi[:, 0:D] + gh[:, 0:D])
        z = jax.nn.sigmoid(gi[:, D:2 * D] + gh[:, D:2 * D])
        n = jnp.tanh(gi[:, 2 * D:3 * D] + r * gh[:, 2 * D:3 * D])
        et = (1.0 - z) * n + z * et

    # Lane-dense (tb, D) output; the tiny polarities dense head runs in XLA.
    out_ref[...] = et


def ram_hops(mem_f, mem_b, asp_f, asp_b, aspect_len, p, hops, *,
             batch_tile=128, vmem_limit_bytes=None):
    T, B, H = mem_f.shape
    D = 2 * H
    if vmem_limit_bytes is None:
        vmem_limit_bytes = _vmem_limit_bytes()
    tb = _pick_tile(B, batch_tile)

    # Hop-invariant precompute.  The fwd/bwd concat is never materialized:
    # mem_cat @ W_k == mem_f @ W_k[:H] + mem_b @ W_k[H:].
    wk, bk = p['attn_wk'], p['attn_bk']
    kx = (_einsum('tbh,hd->btd', mem_f, wk[:H])
          + _einsum('tbh,hd->btd', mem_b, wk[H:])
          + bk[None])                                                  # (B, T, D) f32
    s1 = jnp.einsum('btd,d->bt', kx, p['attn_w1'][0])                  # kx . w[:D]

    # aspect mean-pool (guard against all-padding aspects -> no NaN)
    asp_len_f = jnp.maximum(aspect_len.astype(jnp.float32), 1.0)       # (B, 1)
    et0 = jnp.concatenate([jnp.sum(asp_f, axis=0),
                           jnp.sum(asp_b, axis=0)], axis=-1) / asp_len_f   # (B, D)

    # Fold attention output projection into GRU W_ih (valid because dropout p=0):
    #   gi = (ctx @ wp + bp) @ gih + bih = ctx @ (wp @ gih) + (bp @ gih + bih)
    wcg = p['attn_wp'] @ p['gru_wih']                                  # f32 fold
    bcg = p['attn_bp'] @ p['gru_wih'] + p['gru_bih']

    def const(shape):
        return pl.BlockSpec(shape, lambda b: tuple(0 for _ in shape))

    in_specs = [
        pl.BlockSpec((tb, T, D), lambda b: (b, 0, 0)),   # kx (bf16)
        pl.BlockSpec((tb, T), lambda b: (b, 0)),         # s1
        pl.BlockSpec((tb, D), lambda b: (b, 0)),         # et0
        const((D, D)), const((1, D)), const((1, D)),     # wq, bq, w2
        const((D, 3 * D)), const((1, 3 * D)),            # folded W_ih, b_ih
        const((D, 3 * D)), const((1, 3 * D)),            # gru W_hh, b_hh
    ]
    et = pl.pallas_call(
        functools.partial(_ram_hops_kernel, hops=hops),
        out_shape=jax.ShapeDtypeStruct((B, D), jnp.float32),
        grid=(B // tb,),
        in_specs=in_specs,
        out_specs=pl.BlockSpec((tb, D), lambda b: (b, 0)),
        compiler_params=pltpu.CompilerParams(
            dimension_semantics=("parallel",),
            vmem_limit_bytes=vmem_limit_bytes),
    )(kx.astype(jnp.bfloat16), s1, et0,
      p['attn_wq'].astype(_DOT_DTYPE), p['attn_bq'], p['attn_w2'],
      wcg.astype(_DOT_DTYPE), bcg,
      p['gru_whh'].astype(_DOT_DTYPE), p['gru_bhh'])

    # dense head (B, D) @ (D, polarities): negligible, lane-sparse -> keep in XLA.
    return et @ p['dense_w'] + p['dense_b']


# ---------------------------------------------------------------- forward ----
def ram_forward(text_raw_indices, aspect_indices, params, *, hops, hidden):
    # lengths + embedding lookup kept in XLA.
    # TODO(synk): embedding lookup is a data-dependent HBM gather; kept as jnp.take.
    memory_len = jnp.sum(text_raw_indices != 0, axis=-1).astype(jnp.int32)[:, None]
    aspect_len = jnp.sum(aspect_indices != 0, axis=-1).astype(jnp.int32)[:, None]
    memory_emb = jnp.take(params['embedding'], text_raw_indices, axis=0)
    aspect_emb = jnp.take(params['embedding'], aspect_indices, axis=0)

    mem_f, mem_b = bilstm(memory_emb, memory_len, params['lstm_ctx'], hidden)
    asp_f, asp_b = bilstm(aspect_emb, aspect_len, params['lstm_asp'], hidden)

    # NOTE: locationed_memory() exists in the reference class but is never called
    # in its forward(), so it is intentionally not implemented here.
    return ram_hops(mem_f, mem_b, asp_f, asp_b, aspect_len, params, hops)


# ------------------------------------------------------------------ params ---
def init_params(key, vocab, embed_dim, hidden_dim, polarities_dim):
    D = 2 * hidden_dim
    keys = iter(jax.random.split(key, 32))

    def nrm(shape, scale=0.1):
        return jax.random.normal(next(keys), shape, jnp.float32) * scale

    def lstm_dir():   # (W_ih^T, W_hh^T, b_ih + b_hh)
        return (nrm((embed_dim, 4 * hidden_dim)),
                nrm((hidden_dim, 4 * hidden_dim)),
                nrm((1, 4 * hidden_dim)))

    embedding = nrm((vocab, embed_dim), 0.5).at[0].set(0.0)   # row 0 = padding token

    return {
        'embedding': embedding,
        'lstm_ctx': lstm_dir() + lstm_dir(),   # fwd-dir params, then bwd-dir
        'lstm_asp': lstm_dir() + lstm_dir(),
        # Attention(hidden_dim*2, score_function='mlp'): w_k, w_q, mlp weight, proj
        'attn_wk': nrm((D, D)), 'attn_bk': nrm((1, D)),
        'attn_wq': nrm((D, D)), 'attn_bq': nrm((1, D)),
        'attn_w1': nrm((1, D)), 'attn_w2': nrm((1, D)),   # mlp weight split in halves
        'attn_wp': nrm((D, D)), 'attn_bp': nrm((1, D)),
        # GRUCell(2H, 2H)
        'gru_wih': nrm((D, 3 * D)), 'gru_bih': nrm((1, 3 * D)),
        'gru_whh': nrm((D, 3 * D)), 'gru_bhh': nrm((1, 3 * D)),
        # dense(2H, polarities)
        'dense_w': nrm((D, polarities_dim)), 'dense_b': nrm((1, polarities_dim)),
    }


if __name__ == "__main__":
    VOCAB, EMBED_DIM, HIDDEN_DIM, POLARITIES, HOPS = 50, 32, 32, 3, 3
    B, T_CTX, T_ASP = 2, 8, 4

    params = init_params(jax.random.PRNGKey(0), VOCAB, EMBED_DIM, HIDDEN_DIM, POLARITIES)

    k1, k2 = jax.random.split(jax.random.PRNGKey(0))
    text_raw_indices = jax.random.randint(k1, (B, T_CTX), 1, VOCAB)
    aspect_indices = jax.random.randint(k2, (B, T_ASP), 1, VOCAB)
    # add trailing padding (token id 0) to exercise variable lengths
    text_raw_indices = text_raw_indices.at[0, 6:].set(0).at[1, 5:].set(0)
    aspect_indices = aspect_indices.at[0, 2:].set(0).at[1, 3:].set(0)

    forward = jax.jit(functools.partial(ram_forward, hops=HOPS, hidden=HIDDEN_DIM))
    out = forward(text_raw_indices, aspect_indices, params)
    jax.block_until_ready(out)
    assert out.shape == (B, POLARITIES)
    print("KERNEL_OK")
</pallas_src>

<mosaic_0001>
module attributes {stable_mosaic.version = 11 : i64} {
  func.func @_bilstm_kernel(%arg0: i32, %arg1: i32, %arg2: memref<1xi32, #tpu.memory_space<smem>>, %arg3: memref<4x2x128xbf16, #tpu.memory_space<vmem>>, %arg4: memref<4x2x128xbf16, #tpu.memory_space<vmem>>, %arg5: memref<2x1xi32, #tpu.memory_space<vmem>>, %arg6: memref<32x128xf32, #tpu.memory_space<vmem>>, %arg7: memref<32x128xf32, #tpu.memory_space<vmem>>, %arg8: memref<4x2x32xf32, #tpu.memory_space<vmem>>, %arg9: memref<4x2x32xf32, #tpu.memory_space<vmem>>, %arg10: memref<2x32xf32, #tpu.memory_space<vmem>>, %arg11: memref<2x32xf32, #tpu.memory_space<vmem>>, %arg12: memref<2x32xf32, #tpu.memory_space<vmem>>, %arg13: memref<2x32xf32, #tpu.memory_space<vmem>>) attributes {dimension_semantics = [#tpu.dimension_semantics<parallel>, #tpu.dimension_semantics<arbitrary>], iteration_bounds = array<i64: 1, 1>, scalar_prefetch = 1 : i64, scratch_operands = 4 : i64, tpu.core_type = #tpu.core_type<tc>, window_params = [{transform_indices = @transform_0, window_bounds = array<i64: 4, 2, 128>}, {transform_indices = @transform_1, window_bounds = array<i64: 4, 2, 128>}, {transform_indices = @transform_2, window_bounds = array<i64: 2, 1>}, {pipeline_mode = #tpu.pipeline_mode<synchronous>, transform_indices = @transform_3, window_bounds = array<i64: 32, 128>}, {pipeline_mode = #tpu.pipeline_mode<synchronous>, transform_indices = @transform_4, window_bounds = array<i64: 32, 128>}, {transform_indices = @transform_5, window_bounds = array<i64: 4, 2, 32>}, {transform_indices = @transform_6, window_bounds = array<i64: 4, 2, 32>}]} {
    %c0_i32 = arith.constant 0 : i32
    %0 = arith.cmpi eq, %arg1, %c0_i32 : i32
    %1 = arith.extui %0 : i1 to i32
    %c0_i32_0 = arith.constant 0 : i32
    %2 = arith.cmpi ne, %1, %c0_i32_0 : i32
    scf.if %2 {
      %cst = arith.constant 0.000000e+00 : f32
      %16 = vector.broadcast %cst : f32 to vector<2x32xf32>
      %c0 = arith.constant 0 : index
      %c0_5 = arith.constant 0 : index
      %17 = vector.load %arg10[%c0, %c0_5] : memref<2x32xf32, #tpu.memory_space<vmem>>, vector<2x32xf32>
      tpu.vector_store %arg10[%c0, %c0_5], %16 {strides = array<i32>} : memref<2x32xf32, #tpu.memory_space<vmem>>, vector<2x32xf32>,
      %c0_6 = arith.constant 0 : index
      %c0_7 = arith.constant 0 : index
      %18 = vector.load %arg11[%c0_6, %c0_7] : memref<2x32xf32, #tpu.memory_space<vmem>>, vector<2x32xf32>
      tpu.vector_store %arg11[%c0_6, %c0_7], %16 {strides = array<i32>} : memref<2x32xf32, #tpu.memory_space<vmem>>, vector<2x32xf32>,
      %c0_8 = arith.constant 0 : index
      %c0_9 = arith.constant 0 : index
      %19 = vector.load %arg12[%c0_8, %c0_9] : memref<2x32xf32, #tpu.memory_space<vmem>>, vector<2x32xf32>
      tpu.vector_store %arg12[%c0_8, %c0_9], %16 {strides = array<i32>} : memref<2x32xf32, #tpu.memory_space<vmem>>, vector<2x32xf32>,
      %c0_10 = arith.constant 0 : index
      %c0_11 = arith.constant 0 : index
      %20 = vector.load %arg13[%c0_10, %c0_11] : memref<2x32xf32, #tpu.memory_space<vmem>>, vector<2x32xf32>
      tpu.vector_store %arg13[%c0_10, %c0_11], %16 {strides = array<i32>} : memref<2x32xf32, #tpu.memory_space<vmem>>, vector<2x32xf32>,
    } else {
    }
    %3 = arith.index_cast %arg0 : i32 to index
    %4 = memref.load %arg2[%3] : memref<1xi32, #tpu.memory_space<smem>>
    %c4_i32 = arith.constant 4 : i32
    %5 = arith.muli %arg1, %c4_i32 : i32
    %c0_i32_1 = arith.constant 0 : i32
    %6 = arith.subi %c0_i32_1, %arg1 : i32
    %c4_i32_2 = arith.constant 4 : i32
    %7 = arith.muli %6, %c4_i32_2 : i32
    %8 = arith.cmpi sgt, %4, %5 : i32
    %9 = arith.cmpi sgt, %4, %7 : i32
    %10 = arith.ori %8, %9 : i1
    %11 = arith.extui %10 : i1 to i32
    %c0_i32_3 = arith.constant 0 : i32
    %12 = arith.cmpi ne, %11, %c0_i32_3 : i32
    scf.if %12 {
      %c0 = arith.constant 0 : index
      %c0_5 = arith.constant 0 : index
      %16 = vector.load %arg5[%c0, %c0_5] : memref<2x1xi32, #tpu.memory_space<vmem>>, vector<2x1xi32>
      %c0_6 = arith.constant 0 : index
      %c0_7 = arith.constant 0 : index
      %17 = vector.load %arg6[%c0_6, %c0_7] : memref<32x128xf32, #tpu.memory_space<vmem>>, vector<32x128xf32>
      %c0_8 = arith.constant 0 : index
      %c0_9 = arith.constant 0 : index
      %18 = vector.load %arg7[%c0_8, %c0_9] : memref<32x128xf32, #tpu.memory_space<vmem>>, vector<32x128xf32>
      %c0_10 = arith.constant 0 : index
      %c0_11 = arith.constant 0 : index
      %19 = vector.load %arg10[%c0_10, %c0_11] : memref<2x32xf32, #tpu.memory_space<vmem>>, vector<2x32xf32>
      %c0_12 = arith.constant 0 : index
      %c0_13 = arith.constant 0 : index
      %20 = vector.load %arg11[%c0_12, %c0_13] : memref<2x32xf32, #tpu.memory_space<vmem>>, vector<2x32xf32>
      %c0_14 = arith.constant 0 : index
      %c0_15 = arith.constant 0 : index
      %21 = vector.load %arg12[%c0_14, %c0_15] : memref<2x32xf32, #tpu.memory_space<vmem>>, vector<2x32xf32>
      %c0_16 = arith.constant 0 : index
      %c0_17 = arith.constant 0 : index
      %22 = vector.load %arg13[%c0_16, %c0_17] : memref<2x32xf32, #tpu.memory_space<vmem>>, vector<2x32xf32>
      %c0_i32_18 = arith.constant 0 : i32
      %c4_i32_19 = arith.constant 4 : i32
      %23 = arith.addi %c0_i32_18, %c4_i32_19 : i32
      %c1_i32 = arith.constant 1 : i32
      %24:4 = scf.for %arg14 = %c0_i32_18 to %23 step %c1_i32 iter_args(%arg15 = %19, %arg16 = %20, %arg17 = %21, %arg18 = %22) -> (vector<2x32xf32>, vector<2x32xf32>, vector<2x32xf32>, vector<2x32xf32>)  : i32 {
        %29 = arith.addi %5, %arg14 : i32
        %c3_i32 = arith.constant 3 : i32
        %30 = arith.subi %c3_i32, %arg14 : i32
        %31 = arith.addi %7, %30 : i32
        %32 = arith.index_cast %arg14 : i32 to index
        %c0_29 = arith.constant 0 : index
        %c0_30 = arith.constant 0 : index
        %33 = vector.load %arg3[%32, %c0_29, %c0_30] : memref<4x2x128xbf16, #tpu.memory_space<vmem>>, vector<1x2x128xbf16>
        %34 = vector.shape_cast %33 : vector<1x2x128xbf16> to vector<2x128xbf16>
        %35 = arith.extf %34 : vector<2x128xbf16> to vector<2x128xf32>
        %cst = arith.constant dense<0.000000e+00> : vector<2x128xf32>
        %36 = tpu.matmul %arg15, %17, %cst {dimension_numbers = #tpu.dot_dimension_numbers<[1], [0], [0], [1], [0, 0, 1, 1], [], []>} : vector<2x32xf32>, vector<32x128xf32>, vector<2x128xf32> -> vector<2x128xf32>
        %37 = arith.addf %35, %36 : vector<2x128xf32>
        %38 = arith.index_cast %30 : i32 to index
        %c0_31 = arith.constant 0 : index
        %c0_32 = arith.constant 0 : index
        %39 = vector.load %arg4[%38, %c0_31, %c0_32] : memref<4x2x128xbf16, #tpu.memory_space<vmem>>, vector<1x2x128xbf16>
        %40 = vector.shape_cast %39 : vector<1x2x128xbf16> to vector<2x128xbf16>
        %41 = arith.extf %40 : vector<2x128xbf16> to vector<2x128xf32>
        %cst_33 = arith.constant dense<0.000000e+00> : vector<2x128xf32>
        %42 = tpu.matmul %arg17, %18, %cst_33 {dimension_numbers = #tpu.dot_dimension_numbers<[1], [0], [0], [1], [0, 0, 1, 1], [], []>} : vector<2x32xf32>, vector<32x128xf32>, vector<2x128xf32> -> vector<2x128xf32>
        %43 = arith.addf %41, %42 : vector<2x128xf32>
        %44 = vector.extract_strided_slice %37 {offsets = [0, 0], sizes = [2, 32], strides = [1, 1]} : vector<2x128xf32> to vector<2x32xf32>
        %45 = arith.negf %44 : vector<2x32xf32>
        %46 = math.exp %45 : vector<2x32xf32>
        %cst_34 = arith.constant 1.000000e+00 : f32
        %47 = vector.broadcast %cst_34 : f32 to vector<2x32xf32>
        %48 = arith.addf %47, %46 : vector<2x32xf32>
        %49 = arith.divf %47, %48 : vector<2x32xf32>
        %50 = vector.extract_strided_slice %37 {offsets = [0, 32], sizes = [2, 32], strides = [1, 1]} : vector<2x128xf32> to vector<2x32xf32>
        %51 = arith.negf %50 : vector<2x32xf32>
        %52 = math.exp %51 : vector<2x32xf32>
        %cst_35 = arith.constant 1.000000e+00 : f32
        %53 = vector.broadcast %cst_35 : f32 to vector<2x32xf32>
        %54 = arith.addf %53, %52 : vector<2x32xf32>
        %55 = arith.divf %53, %54 : vector<2x32xf32>
        %56 = vector.extract_strided_slice %37 {offsets = [0, 64], sizes = [2, 32], strides = [1, 1]} : vector<2x128xf32> to vector<2x32xf32>
        %57 = math.tanh %56 : vector<2x32xf32>
        %58 = vector.extract_strided_slice %37 {offsets = [0, 96], sizes = [2, 32], strides = [1, 1]} : vector<2x128xf32> to vector<2x32xf32>
        %59 = arith.negf %58 : vector<2x32xf32>
        %60 = math.exp %59 : vector<2x32xf32>
        %cst_36 = arith.constant 1.000000e+00 : f32
        %61 = vector.broadcast %cst_36 : f32 to vector<2x32xf32>
        %62 = arith.addf %61, %60 : vector<2x32xf32>
        %63 = arith.divf %61, %62 : vector<2x32xf32>
        %64 = arith.mulf %55, %arg16 : vector<2x32xf32>
        %65 = arith.mulf %49, %57 : vector<2x32xf32>
        %66 = arith.addf %64, %65 : vector<2x32xf32>
        %67 = math.tanh %66 : vector<2x32xf32>
        %68 = arith.mulf %63, %67 : vector<2x32xf32>
        %69 = vector.extract_strided_slice %43 {offsets = [0, 0], sizes = [2, 32], strides = [1, 1]} : vector<2x128xf32> to vector<2x32xf32>
        %70 = arith.negf %69 : vector<2x32xf32>
        %71 = math.exp %70 : vector<2x32xf32>
        %cst_37 = arith.constant 1.000000e+00 : f32
        %72 = vector.broadcast %cst_37 : f32 to vector<2x32xf32>
        %73 = arith.addf %72, %71 : vector<2x32xf32>
        %74 = arith.divf %72, %73 : vector<2x32xf32>
        %75 = vector.extract_strided_slice %43 {offsets = [0, 32], sizes = [2, 32], strides = [1, 1]} : vector<2x128xf32> to vector<2x32xf32>
        %76 = arith.negf %75 : vector<2x32xf32>
        %77 = math.exp %76 : vector<2x32xf32>
        %cst_38 = arith.constant 1.000000e+00 : f32
        %78 = vector.broadcast %cst_38 : f32 to vector<2x32xf32>
        %79 = arith.addf %78, %77 : vector<2x32xf32>
        %80 = arith.divf %78, %79 : vector<2x32xf32>
        %81 = vector.extract_strided_slice %43 {offsets = [0, 64], sizes = [2, 32], strides = [1, 1]} : vector<2x128xf32> to vector<2x32xf32>
        %82 = math.tanh %81 : vector<2x32xf32>
        %83 = vector.extract_strided_slice %43 {offsets = [0, 96], sizes = [2, 32], strides = [1, 1]} : vector<2x128xf32> to vector<2x32xf32>
        %84 = arith.negf %83 : vector<2x32xf32>
        %85 = math.exp %84 : vector<2x32xf32>
        %cst_39 = arith.constant 1.000000e+00 : f32
        %86 = vector.broadcast %cst_39 : f32 to vector<2x32xf32>
        %87 = arith.addf %86, %85 : vector<2x32xf32>
        %88 = arith.divf %86, %87 : vector<2x32xf32>
        %89 = arith.mulf %80, %arg18 : vector<2x32xf32>
        %90 = arith.mulf %74, %82 : vector<2x32xf32>
        %91 = arith.addf %89, %90 : vector<2x32xf32>
        %92 = math.tanh %91 : vector<2x32xf32>
        %93 = arith.mulf %88, %92 : vector<2x32xf32>
        %94 = vector.broadcast %29 : i32 to vector<2x1xi32>
        %95 = arith.cmpi sgt, %16, %94 : vector<2x1xi32>
        %96 = vector.broadcast %31 : i32 to vector<2x1xi32>
        %97 = arith.cmpi sgt, %16, %96 : vector<2x1xi32>
        %98 = vector.shape_cast %95 : vector<2x1xi1> to vector<2x1xi1>
        %99 = vector.broadcast %98 : vector<2x1xi1> to vector<2x32xi1>
        %100 = arith.select %99, %68, %arg15 : vector<2x32xi1>, vector<2x32xf32>
        %101 = vector.shape_cast %95 : vector<2x1xi1> to vector<2x1xi1>
        %102 = vector.broadcast %101 : vector<2x1xi1> to vector<2x32xi1>
        %103 = arith.select %102, %66, %arg16 : vector<2x32xi1>, vector<2x32xf32>
        %104 = vector.shape_cast %97 : vector<2x1xi1> to vector<2x1xi1>
        %105 = vector.broadcast %104 : vector<2x1xi1> to vector<2x32xi1>
        %106 = arith.select %105, %93, %arg17 : vector<2x32xi1>, vector<2x32xf32>
        %107 = vector.shape_cast %97 : vector<2x1xi1> to vector<2x1xi1>
        %108 = vector.broadcast %107 : vector<2x1xi1> to vector<2x32xi1>
        %109 = arith.select %108, %91, %arg18 : vector<2x32xi1>, vector<2x32xf32>
        %cst_40 = arith.constant 0.000000e+00 : f32
        %110 = vector.shape_cast %95 : vector<2x1xi1> to vector<2x1xi1>
        %111 = vector.broadcast %110 : vector<2x1xi1> to vector<2x32xi1>
        %112 = vector.broadcast %cst_40 : f32 to vector<2x32xf32>
        %113 = arith.select %111, %68, %112 : vector<2x32xi1>, vector<2x32xf32>
        %114 = arith.index_cast %arg14 : i32 to index
        %c0_41 = arith.constant 0 : index
        %c0_42 = arith.constant 0 : index
        %115 = vector.load %arg8[%114, %c0_41, %c0_42] : memref<4x2x32xf32, #tpu.memory_space<vmem>>, vector<1x2x32xf32>
        %116 = vector.shape_cast %115 : vector<1x2x32xf32> to vector<2x32xf32>
        %117 = vector.shape_cast %113 : vector<2x32xf32> to vector<1x2x32xf32>
        tpu.vector_store %arg8[%114, %c0_41, %c0_42], %117 {strides = array<i32>} : memref<4x2x32xf32, #tpu.memory_space<vmem>>, vector<1x2x32xf32>,
        %cst_43 = arith.constant 0.000000e+00 : f32
        %118 = vector.shape_cast %97 : vector<2x1xi1> to vector<2x1xi1>
        %119 = vector.broadcast %118 : vector<2x1xi1> to vector<2x32xi1>
        %120 = vector.broadcast %cst_43 : f32 to vector<2x32xf32>
        %121 = arith.select %119, %93, %120 : vector<2x32xi1>, vector<2x32xf32>
        %122 = arith.index_cast %30 : i32 to index
        %c0_44 = arith.constant 0 : index
        %c0_45 = arith.constant 0 : index
        %123 = vector.load %arg9[%122, %c0_44, %c0_45] : memref<4x2x32xf32, #tpu.memory_space<vmem>>, vector<1x2x32xf32>
        %124 = vector.shape_cast %123 : vector<1x2x32xf32> to vector<2x32xf32>
        %125 = vector.shape_cast %121 : vector<2x32xf32> to vector<1x2x32xf32>
        tpu.vector_store %arg9[%122, %c0_44, %c0_45], %125 {strides = array<i32>} : memref<4x2x32xf32, #tpu.memory_space<vmem>>, vector<1x2x32xf32>,
        scf.yield %100, %103, %106, %109 : vector<2x32xf32>, vector<2x32xf32>, vector<2x32xf32>, vector<2x32xf32>
      }
      %c4_i32_20 = arith.constant 4 : i32
      %c0_21 = arith.constant 0 : index
      %c0_22 = arith.constant 0 : index
      %25 = vector.load %arg10[%c0_21, %c0_22] : memref<2x32xf32, #tpu.memory_space<vmem>>, vector<2x32xf32>
      tpu.vector_store %arg10[%c0_21, %c0_22], %24#0 {strides = array<i32>} : memref<2x32xf32, #tpu.memory_space<vmem>>, vector<2x32xf32>,
      %c0_23 = arith.constant 0 : index
      %c0_24 = arith.constant 0 : index
      %26 = vector.load %arg11[%c0_23, %c0_24] : memref<2x32xf32, #tpu.memory_space<vmem>>, vector<2x32xf32>
      tpu.vector_store %arg11[%c0_23, %c0_24], %24#1 {strides = array<i32>} : memref<2x32xf32, #tpu.memory_space<vmem>>, vector<2x32xf32>,
      %c0_25 = arith.constant 0 : index
      %c0_26 = arith.constant 0 : index
      %27 = vector.load %arg12[%c0_25, %c0_26] : memref<2x32xf32, #tpu.memory_space<vmem>>, vector<2x32xf32>
      tpu.vector_store %arg12[%c0_25, %c0_26], %24#2 {strides = array<i32>} : memref<2x32xf32, #tpu.memory_space<vmem>>, vector<2x32xf32>,
      %c0_27 = arith.constant 0 : index
      %c0_28 = arith.constant 0 : index
      %28 = vector.load %arg13[%c0_27, %c0_28] : memref<2x32xf32, #tpu.memory_space<vmem>>, vector<2x32xf32>
      tpu.vector_store %arg13[%c0_27, %c0_28], %24#3 {strides = array<i32>} : memref<2x32xf32, #tpu.memory_space<vmem>>, vector<2x32xf32>,
    } else {
    }
    %true = arith.constant true
    %13 = arith.xori %10, %true : i1
    %14 = arith.extui %13 : i1 to i32
    %c0_i32_4 = arith.constant 0 : i32
    %15 = arith.cmpi ne, %14, %c0_i32_4 : i32
    scf.if %15 {
      %cst = arith.constant 0.000000e+00 : f32
      %16 = vector.broadcast %cst : f32 to vector<4x2x32xf32>
      %c0 = arith.constant 0 : index
      %c0_5 = arith.constant 0 : index
      %c0_6 = arith.constant 0 : index
      %17 = vector.load %arg8[%c0, %c0_5, %c0_6] : memref<4x2x32xf32, #tpu.memory_space<vmem>>, vector<4x2x32xf32>
      tpu.vector_store %arg8[%c0, %c0_5, %c0_6], %16 {strides = array<i32>} : memref<4x2x32xf32, #tpu.memory_space<vmem>>, vector<4x2x32xf32>,
      %cst_7 = arith.constant 0.000000e+00 : f32
      %18 = vector.broadcast %cst_7 : f32 to vector<4x2x32xf32>
      %c0_8 = arith.constant 0 : index
      %c0_9 = arith.constant 0 : index
      %c0_10 = arith.constant 0 : index
      %19 = vector.load %arg9[%c0_8, %c0_9, %c0_10] : memref<4x2x32xf32, #tpu.memory_space<vmem>>, vector<4x2x32xf32>
      tpu.vector_store %arg9[%c0_8, %c0_9, %c0_10], %18 {strides = array<i32>} : memref<4x2x32xf32, #tpu.memory_space<vmem>>, vector<4x2x32xf32>,
    } else {
    }
    return
  }
  func.func @transform_0(%arg0: i32, %arg1: i32, %arg2: memref<1xi32, #tpu.memory_space<smem>>) -> (i32, i32, i32) {
    %c0_i32 = arith.constant 0 : i32
    %c0_i32_0 = arith.constant 0 : i32
    return %arg1, %arg0, %c0_i32 : i32, i32, i32
  }
  func.func @transform_1(%arg0: i32, %arg1: i32, %arg2: memref<1xi32, #tpu.memory_space<smem>>) -> (i32, i32, i32) {
    %c0_i32 = arith.constant 0 : i32
    %0 = arith.subi %c0_i32, %arg1 : i32
    %c0_i32_0 = arith.constant 0 : i32
    %c0_i32_1 = arith.constant 0 : i32
    return %0, %arg0, %c0_i32_0 : i32, i32, i32
  }
  func.func @transform_2(%arg0: i32, %arg1: i32, %arg2: memref<1xi32, #tpu.memory_space<smem>>) -> (i32, i32) {
    %c0_i32 = arith.constant 0 : i32
    %c0_i32_0 = arith.constant 0 : i32
    return %arg0, %c0_i32 : i32, i32
  }
  func.func @transform_3(%arg0: i32, %arg1: i32, %arg2: memref<1xi32, #tpu.memory_space<smem>>) -> (i32, i32) {
    %c0_i32 = arith.constant 0 : i32
    %c0_i32_0 = arith.constant 0 : i32
    %c0_i32_1 = arith.constant 0 : i32
    return %c0_i32, %c0_i32_0 : i32, i32
  }
  func.func @transform_4(%arg0: i32, %arg1: i32, %arg2: memref<1xi32, #tpu.memory_space<smem>>) -> (i32, i32) {
    %c0_i32 = arith.constant 0 : i32
    %c0_i32_0 = arith.constant 0 : i32
    %c0_i32_1 = arith.constant 0 : i32
    return %c0_i32, %c0_i32_0 : i32, i32
  }
  func.func @transform_5(%arg0: i32, %arg1: i32, %arg2: memref<1xi32, #tpu.memory_space<smem>>) -> (i32, i32, i32) {
    %c0_i32 = arith.constant 0 : i32
    %c0_i32_0 = arith.constant 0 : i32
    return %arg1, %arg0, %c0_i32 : i32, i32, i32
  }
  func.func @transform_6(%arg0: i32, %arg1: i32, %arg2: memref<1xi32, #tpu.memory_space<smem>>) -> (i32, i32, i32) {
    %c0_i32 = arith.constant 0 : i32
    %0 = arith.subi %c0_i32, %arg1 : i32
    %c0_i32_0 = arith.constant 0 : i32
    %c0_i32_1 = arith.constant 0 : i32
    return %0, %arg0, %c0_i32_0 : i32, i32, i32
  }
}

module attributes {stable_mosaic.version = 11 : i64} {
  func.func @_bilstm_kernel(%arg0: i32, %arg1: i32, %arg2: memref<1xi32, #tpu.memory_space<smem>>, %arg3: memref<8x2x128xbf16, #tpu.memory_space<vmem>>, %arg4: memref<8x2x128xbf16, #tpu.memory_space<vmem>>, %arg5: memref<2x1xi32, #tpu.memory_space<vmem>>, %arg6: memref<32x128xf32, #tpu.memory_space<vmem>>, %arg7: memref<32x128xf32, #tpu.memory_space<vmem>>, %arg8: memref<8x2x32xf32, #tpu.memory_space<vmem>>, %arg9: memref<8x2x32xf32, #tpu.memory_space<vmem>>, %arg10: memref<2x32xf32, #tpu.memory_space<vmem>>, %arg11: memref<2x32xf32, #tpu.memory_space<vmem>>, %arg12: memref<2x32xf32, #tpu.memory_space<vmem>>, %arg13: memref<2x32xf32, #tpu.memory_space<vmem>>) attributes {dimension_semantics = [#tpu.dimension_semantics<parallel>, #tpu.dimension_semantics<arbitrary>], iteration_bounds = array<i64: 1, 1>, scalar_prefetch = 1 : i64, scratch_operands = 4 : i64, tpu.core_type = #tpu.core_type<tc>, window_params = [{transform_indices = @transform_0, window_bounds = array<i64: 8, 2, 128>}, {transform_indices = @transform_1, window_bounds = array<i64: 8, 2, 128>}, {transform_indices = @transform_2, window_bounds = array<i64: 2, 1>}, {pipeline_mode = #tpu.pipeline_mode<synchronous>, transform_indices = @transform_3, window_bounds = array<i64: 32, 128>}, {pipeline_mode = #tpu.pipeline_mode<synchronous>, transform_indices = @transform_4, window_bounds = array<i64: 32, 128>}, {transform_indices = @transform_5, window_bounds = array<i64: 8, 2, 32>}, {transform_indices = @transform_6, window_bounds = array<i64: 8, 2, 32>}]} {
    %c0_i32 = arith.constant 0 : i32
    %0 = arith.cmpi eq, %arg1, %c0_i32 : i32
    %1 = arith.extui %0 : i1 to i32
    %c0_i32_0 = arith.constant 0 : i32
    %2 = arith.cmpi ne, %1, %c0_i32_0 : i32
    scf.if %2 {
      %cst = arith.constant 0.000000e+00 : f32
      %16 = vector.broadcast %cst : f32 to vector<2x32xf32>
      %c0 = arith.constant 0 : index
      %c0_5 = arith.constant 0 : index
      %17 = vector.load %arg10[%c0, %c0_5] : memref<2x32xf32, #tpu.memory_space<vmem>>, vector<2x32xf32>
      tpu.vector_store %arg10[%c0, %c0_5], %16 {strides = array<i32>} : memref<2x32xf32, #tpu.memory_space<vmem>>, vector<2x32xf32>,
      %c0_6 = arith.constant 0 : index
      %c0_7 = arith.constant 0 : index
      %18 = vector.load %arg11[%c0_6, %c0_7] : memref<2x32xf32, #tpu.memory_space<vmem>>, vector<2x32xf32>
      tpu.vector_store %arg11[%c0_6, %c0_7], %16 {strides = array<i32>} : memref<2x32xf32, #tpu.memory_space<vmem>>, vector<2x32xf32>,
      %c0_8 = arith.constant 0 : index
      %c0_9 = arith.constant 0 : index
      %19 = vector.load %arg12[%c0_8, %c0_9] : memref<2x32xf32, #tpu.memory_space<vmem>>, vector<2x32xf32>
      tpu.vector_store %arg12[%c0_8, %c0_9], %16 {strides = array<i32>} : memref<2x32xf32, #tpu.memory_space<vmem>>, vector<2x32xf32>,
      %c0_10 = arith.constant 0 : index
      %c0_11 = arith.constant 0 : index
      %20 = vector.load %arg13[%c0_10, %c0_11] : memref<2x32xf32, #tpu.memory_space<vmem>>, vector<2x32xf32>
      tpu.vector_store %arg13[%c0_10, %c0_11], %16 {strides = array<i32>} : memref<2x32xf32, #tpu.memory_space<vmem>>, vector<2x32xf32>,
    } else {
    }
    %3 = arith.index_cast %arg0 : i32 to index
    %4 = memref.load %arg2[%3] : memref<1xi32, #tpu.memory_space<smem>>
    %c8_i32 = arith.constant 8 : i32
    %5 = arith.muli %arg1, %c8_i32 : i32
    %c0_i32_1 = arith.constant 0 : i32
    %6 = arith.subi %c0_i32_1, %arg1 : i32
    %c8_i32_2 = arith.constant 8 : i32
    %7 = arith.muli %6, %c8_i32_2 : i32
    %8 = arith.cmpi sgt, %4, %5 : i32
    %9 = arith.cmpi sgt, %4, %7 : i32
    %10 = arith.ori %8, %9 : i1
    %11 = arith.extui %10 : i1 to i32
    %c0_i32_3 = arith.constant 0 : i32
    %12 = arith.cmpi ne, %11, %c0_i32_3 : i32
    scf.if %12 {
      %c0 = arith.constant 0 : index
      %c0_5 = arith.constant 0 : index
      %16 = vector.load %arg5[%c0, %c0_5] : memref<2x1xi32, #tpu.memory_space<vmem>>, vector<2x1xi32>
      %c0_6 = arith.constant 0 : index
      %c0_7 = arith.constant 0 : index
      %17 = vector.load %arg6[%c0_6, %c0_7] : memref<32x128xf32, #tpu.memory_space<vmem>>, vector<32x128xf32>
      %c0_8 = arith.constant 0 : index
      %c0_9 = arith.constant 0 : index
      %18 = vector.load %arg7[%c0_8, %c0_9] : memref<32x128xf32, #tpu.memory_space<vmem>>, vector<32x128xf32>
      %c0_10 = arith.constant 0 : index
      %c0_11 = arith.constant 0 : index
      %19 = vector.load %arg10[%c0_10, %c0_11] : memref<2x32xf32, #tpu.memory_space<vmem>>, vector<2x32xf32>
      %c0_12 = arith.constant 0 : index
      %c0_13 = arith.constant 0 : index
      %20 = vector.load %arg11[%c0_12, %c0_13] : memref<2x32xf32, #tpu.memory_space<vmem>>, vector<2x32xf32>
      %c0_14 = arith.constant 0 : index
      %c0_15 = arith.constant 0 : index
      %21 = vector.load %arg12[%c0_14, %c0_15] : memref<2x32xf32, #tpu.memory_space<vmem>>, vector<2x32xf32>
      %c0_16 = arith.constant 0 : index
      %c0_17 = arith.constant 0 : index
      %22 = vector.load %arg13[%c0_16, %c0_17] : memref<2x32xf32, #tpu.memory_space<vmem>>, vector<2x32xf32>
      %c0_i32_18 = arith.constant 0 : i32
      %c8_i32_19 = arith.constant 8 : i32
      %23 = arith.addi %c0_i32_18, %c8_i32_19 : i32
      %c1_i32 = arith.constant 1 : i32
      %24:4 = scf.for %arg14 = %c0_i32_18 to %23 step %c1_i32 iter_args(%arg15 = %19, %arg16 = %20, %arg17 = %21, %arg18 = %22) -> (vector<2x32xf32>, vector<2x32xf32>, vector<2x32xf32>, vector<2x32xf32>)  : i32 {
        %29 = arith.addi %5, %arg14 : i32
        %c7_i32 = arith.constant 7 : i32
        %30 = arith.subi %c7_i32, %arg14 : i32
        %31 = arith.addi %7, %30 : i32
        %32 = arith.index_cast %arg14 : i32 to index
        %c0_29 = arith.constant 0 : index
        %c0_30 = arith.constant 0 : index
        %33 = vector.load %arg3[%32, %c0_29, %c0_30] : memref<8x2x128xbf16, #tpu.memory_space<vmem>>, vector<1x2x128xbf16>
        %34 = vector.shape_cast %33 : vector<1x2x128xbf16> to vector<2x128xbf16>
        %35 = arith.extf %34 : vector<2x128xbf16> to vector<2x128xf32>
        %cst = arith.constant dense<0.000000e+00> : vector<2x128xf32>
        %36 = tpu.matmul %arg15, %17, %cst {dimension_numbers = #tpu.dot_dimension_numbers<[1], [0], [0], [1], [0, 0, 1, 1], [], []>} : vector<2x32xf32>, vector<32x128xf32>, vector<2x128xf32> -> vector<2x128xf32>
        %37 = arith.addf %35, %36 : vector<2x128xf32>
        %38 = arith.index_cast %30 : i32 to index
        %c0_31 = arith.constant 0 : index
        %c0_32 = arith.constant 0 : index
        %39 = vector.load %arg4[%38, %c0_31, %c0_32] : memref<8x2x128xbf16, #tpu.memory_space<vmem>>, vector<1x2x128xbf16>
        %40 = vector.shape_cast %39 : vector<1x2x128xbf16> to vector<2x128xbf16>
        %41 = arith.extf %40 : vector<2x128xbf16> to vector<2x128xf32>
        %cst_33 = arith.constant dense<0.000000e+00> : vector<2x128xf32>
        %42 = tpu.matmul %arg17, %18, %cst_33 {dimension_numbers = #tpu.dot_dimension_numbers<[1], [0], [0], [1], [0, 0, 1, 1], [], []>} : vector<2x32xf32>, vector<32x128xf32>, vector<2x128xf32> -> vector<2x128xf32>
        %43 = arith.addf %41, %42 : vector<2x128xf32>
        %44 = vector.extract_strided_slice %37 {offsets = [0, 0], sizes = [2, 32], strides = [1, 1]} : vector<2x128xf32> to vector<2x32xf32>
        %45 = arith.negf %44 : vector<2x32xf32>
        %46 = math.exp %45 : vector<2x32xf32>
        %cst_34 = arith.constant 1.000000e+00 : f32
        %47 = vector.broadcast %cst_34 : f32 to vector<2x32xf32>
        %48 = arith.addf %47, %46 : vector<2x32xf32>
        %49 = arith.divf %47, %48 : vector<2x32xf32>
        %50 = vector.extract_strided_slice %37 {offsets = [0, 32], sizes = [2, 32], strides = [1, 1]} : vector<2x128xf32> to vector<2x32xf32>
        %51 = arith.negf %50 : vector<2x32xf32>
        %52 = math.exp %51 : vector<2x32xf32>
        %cst_35 = arith.constant 1.000000e+00 : f32
        %53 = vector.broadcast %cst_35 : f32 to vector<2x32xf32>
        %54 = arith.addf %53, %52 : vector<2x32xf32>
        %55 = arith.divf %53, %54 : vector<2x32xf32>
        %56 = vector.extract_strided_slice %37 {offsets = [0, 64], sizes = [2, 32], strides = [1, 1]} : vector<2x128xf32> to vector<2x32xf32>
        %57 = math.tanh %56 : vector<2x32xf32>
        %58 = vector.extract_strided_slice %37 {offsets = [0, 96], sizes = [2, 32], strides = [1, 1]} : vector<2x128xf32> to vector<2x32xf32>
        %59 = arith.negf %58 : vector<2x32xf32>
        %60 = math.exp %59 : vector<2x32xf32>
        %cst_36 = arith.constant 1.000000e+00 : f32
        %61 = vector.broadcast %cst_36 : f32 to vector<2x32xf32>
        %62 = arith.addf %61, %60 : vector<2x32xf32>
        %63 = arith.divf %61, %62 : vector<2x32xf32>
        %64 = arith.mulf %55, %arg16 : vector<2x32xf32>
        %65 = arith.mulf %49, %57 : vector<2x32xf32>
        %66 = arith.addf %64, %65 : vector<2x32xf32>
        %67 = math.tanh %66 : vector<2x32xf32>
        %68 = arith.mulf %63, %67 : vector<2x32xf32>
        %69 = vector.extract_strided_slice %43 {offsets = [0, 0], sizes = [2, 32], strides = [1, 1]} : vector<2x128xf32> to vector<2x32xf32>
        %70 = arith.negf %69 : vector<2x32xf32>
        %71 = math.exp %70 : vector<2x32xf32>
        %cst_37 = arith.constant 1.000000e+00 : f32
        %72 = vector.broadcast %cst_37 : f32 to vector<2x32xf32>
        %73 = arith.addf %72, %71 : vector<2x32xf32>
        %74 = arith.divf %72, %73 : vector<2x32xf32>
        %75 = vector.extract_strided_slice %43 {offsets = [0, 32], sizes = [2, 32], strides = [1, 1]} : vector<2x128xf32> to vector<2x32xf32>
        %76 = arith.negf %75 : vector<2x32xf32>
        %77 = math.exp %76 : vector<2x32xf32>
        %cst_38 = arith.constant 1.000000e+00 : f32
        %78 = vector.broadcast %cst_38 : f32 to vector<2x32xf32>
        %79 = arith.addf %78, %77 : vector<2x32xf32>
        %80 = arith.divf %78, %79 : vector<2x32xf32>
        %81 = vector.extract_strided_slice %43 {offsets = [0, 64], sizes = [2, 32], strides = [1, 1]} : vector<2x128xf32> to vector<2x32xf32>
        %82 = math.tanh %81 : vector<2x32xf32>
        %83 = vector.extract_strided_slice %43 {offsets = [0, 96], sizes = [2, 32], strides = [1, 1]} : vector<2x128xf32> to vector<2x32xf32>
        %84 = arith.negf %83 : vector<2x32xf32>
        %85 = math.exp %84 : vector<2x32xf32>
        %cst_39 = arith.constant 1.000000e+00 : f32
        %86 = vector.broadcast %cst_39 : f32 to vector<2x32xf32>
        %87 = arith.addf %86, %85 : vector<2x32xf32>
        %88 = arith.divf %86, %87 : vector<2x32xf32>
        %89 = arith.mulf %80, %arg18 : vector<2x32xf32>
        %90 = arith.mulf %74, %82 : vector<2x32xf32>
        %91 = arith.addf %89, %90 : vector<2x32xf32>
        %92 = math.tanh %91 : vector<2x32xf32>
        %93 = arith.mulf %88, %92 : vector<2x32xf32>
        %94 = vector.broadcast %29 : i32 to vector<2x1xi32>
        %95 = arith.cmpi sgt, %16, %94 : vector<2x1xi32>
        %96 = vector.broadcast %31 : i32 to vector<2x1xi32>
        %97 = arith.cmpi sgt, %16, %96 : vector<2x1xi32>
        %98 = vector.shape_cast %95 : vector<2x1xi1> to vector<2x1xi1>
        %99 = vector.broadcast %98 : vector<2x1xi1> to vector<2x32xi1>
        %100 = arith.select %99, %68, %arg15 : vector<2x32xi1>, vector<2x32xf32>
        %101 = vector.shape_cast %95 : vector<2x1xi1> to vector<2x1xi1>
        %102 = vector.broadcast %101 : vector<2x1xi1> to vector<2x32xi1>
        %103 = arith.select %102, %66, %arg16 : vector<2x32xi1>, vector<2x32xf32>
        %104 = vector.shape_cast %97 : vector<2x1xi1> to vector<2x1xi1>
        %105 = vector.broadcast %104 : vector<2x1xi1> to vector<2x32xi1>
        %106 = arith.select %105, %93, %arg17 : vector<2x32xi1>, vector<2x32xf32>
        %107 = vector.shape_cast %97 : vector<2x1xi1> to vector<2x1xi1>
        %108 = vector.broadcast %107 : vector<2x1xi1> to vector<2x32xi1>
        %109 = arith.select %108, %91, %arg18 : vector<2x32xi1>, vector<2x32xf32>
        %cst_40 = arith.constant 0.000000e+00 : f32
        %110 = vector.shape_cast %95 : vector<2x1xi1> to vector<2x1xi1>
        %111 = vector.broadcast %110 : vector<2x1xi1> to vector<2x32xi1>
        %112 = vector.broadcast %cst_40 : f32 to vector<2x32xf32>
        %113 = arith.select %111, %68, %112 : vector<2x32xi1>, vector<2x32xf32>
        %114 = arith.index_cast %arg14 : i32 to index
        %c0_41 = arith.constant 0 : index
        %c0_42 = arith.constant 0 : index
        %115 = vector.load %arg8[%114, %c0_41, %c0_42] : memref<8x2x32xf32, #tpu.memory_space<vmem>>, vector<1x2x32xf32>
        %116 = vector.shape_cast %115 : vector<1x2x32xf32> to vector<2x32xf32>
        %117 = vector.shape_cast %113 : vector<2x32xf32> to vector<1x2x32xf32>
        tpu.vector_store %arg8[%114, %c0_41, %c0_42], %117 {strides = array<i32>} : memref<8x2x32xf32, #tpu.memory_space<vmem>>, vector<1x2x32xf32>,
        %cst_43 = arith.constant 0.000000e+00 : f32
        %118 = vector.shape_cast %97 : vector<2x1xi1> to vector<2x1xi1>
        %119 = vector.broadcast %118 : vector<2x1xi1> to vector<2x32xi1>
        %120 = vector.broadcast %cst_43 : f32 to vector<2x32xf32>
        %121 = arith.select %119, %93, %120 : vector<2x32xi1>, vector<2x32xf32>
        %122 = arith.index_cast %30 : i32 to index
        %c0_44 = arith.constant 0 : index
        %c0_45 = arith.constant 0 : index
        %123 = vector.load %arg9[%122, %c0_44, %c0_45] : memref<8x2x32xf32, #tpu.memory_space<vmem>>, vector<1x2x32xf32>
        %124 = vector.shape_cast %123 : vector<1x2x32xf32> to vector<2x32xf32>
        %125 = vector.shape_cast %121 : vector<2x32xf32> to vector<1x2x32xf32>
        tpu.vector_store %arg9[%122, %c0_44, %c0_45], %125 {strides = array<i32>} : memref<8x2x32xf32, #tpu.memory_space<vmem>>, vector<1x2x32xf32>,
        scf.yield %100, %103, %106, %109 : vector<2x32xf32>, vector<2x32xf32>, vector<2x32xf32>, vector<2x32xf32>
      }
      %c8_i32_20 = arith.constant 8 : i32
      %c0_21 = arith.constant 0 : index
      %c0_22 = arith.constant 0 : index
      %25 = vector.load %arg10[%c0_21, %c0_22] : memref<2x32xf32, #tpu.memory_space<vmem>>, vector<2x32xf32>
      tpu.vector_store %arg10[%c0_21, %c0_22], %24#0 {strides = array<i32>} : memref<2x32xf32, #tpu.memory_space<vmem>>, vector<2x32xf32>,
      %c0_23 = arith.constant 0 : index
      %c0_24 = arith.constant 0 : index
      %26 = vector.load %arg11[%c0_23, %c0_24] : memref<2x32xf32, #tpu.memory_space<vmem>>, vector<2x32xf32>
      tpu.vector_store %arg11[%c0_23, %c0_24], %24#1 {strides = array<i32>} : memref<2x32xf32, #tpu.memory_space<vmem>>, vector<2x32xf32>,
      %c0_25 = arith.constant 0 : index
      %c0_26 = arith.constant 0 : index
      %27 = vector.load %arg12[%c0_25, %c0_26] : memref<2x32xf32, #tpu.memory_space<vmem>>, vector<2x32xf32>
      tpu.vector_store %arg12[%c0_25, %c0_26], %24#2 {strides = array<i32>} : memref<2x32xf32, #tpu.memory_space<vmem>>, vector<2x32xf32>,
      %c0_27 = arith.constant 0 : index
      %c0_28 = arith.constant 0 : index
      %28 = vector.load %arg13[%c0_27, %c0_28] : memref<2x32xf32, #tpu.memory_space<vmem>>, vector<2x32xf32>
      tpu.vector_store %arg13[%c0_27, %c0_28], %24#3 {strides = array<i32>} : memref<2x32xf32, #tpu.memory_space<vmem>>, vector<2x32xf32>,
    } else {
    }
    %true = arith.constant true
    %13 = arith.xori %10, %true : i1
    %14 = arith.extui %13 : i1 to i32
    %c0_i32_4 = arith.constant 0 : i32
    %15 = arith.cmpi ne, %14, %c0_i32_4 : i32
    scf.if %15 {
      %cst = arith.constant 0.000000e+00 : f32
      %16 = vector.broadcast %cst : f32 to vector<8x2x32xf32>
      %c0 = arith.constant 0 : index
      %c0_5 = arith.constant 0 : index
      %c0_6 = arith.constant 0 : index
      %17 = vector.load %arg8[%c0, %c0_5, %c0_6] : memref<8x2x32xf32, #tpu.memory_space<vmem>>, vector<8x2x32xf32>
      tpu.vector_store %arg8[%c0, %c0_5, %c0_6], %16 {strides = array<i32>} : memref<8x2x32xf32, #tpu.memory_space<vmem>>, vector<8x2x32xf32>,
      %cst_7 = arith.constant 0.000000e+00 : f32
      %18 = vector.broadcast %cst_7 : f32 to vector<8x2x32xf32>
      %c0_8 = arith.constant 0 : index
      %c0_9 = arith.constant 0 : index
      %c0_10 = arith.constant 0 : index
      %19 = vector.load %arg9[%c0_8, %c0_9, %c0_10] : memref<8x2x32xf32, #tpu.memory_space<vmem>>, vector<8x2x32xf32>
      tpu.vector_store %arg9[%c0_8, %c0_9, %c0_10], %18 {strides = array<i32>} : memref<8x2x32xf32, #tpu.memory_space<vmem>>, vector<8x2x32xf32>,
    } else {
    }
    return
  }
  func.func @transform_0(%arg0: i32, %arg1: i32, %arg2: memref<1xi32, #tpu.memory_space<smem>>) -> (i32, i32, i32) {
    %c0_i32 = arith.constant 0 : i32
    %c0_i32_0 = arith.constant 0 : i32
    return %arg1, %arg0, %c0_i32 : i32, i32, i32
  }
  func.func @transform_1(%arg0: i32, %arg1: i32, %arg2: memref<1xi32, #tpu.memory_space<smem>>) -> (i32, i32, i32) {
    %c0_i32 = arith.constant 0 : i32
    %0 = arith.subi %c0_i32, %arg1 : i32
    %c0_i32_0 = arith.constant 0 : i32
    %c0_i32_1 = arith.constant 0 : i32
    return %0, %arg0, %c0_i32_0 : i32, i32, i32
  }
  func.func @transform_2(%arg0: i32, %arg1: i32, %arg2: memref<1xi32, #tpu.memory_space<smem>>) -> (i32, i32) {
    %c0_i32 = arith.constant 0 : i32
    %c0_i32_0 = arith.constant 0 : i32
    return %arg0, %c0_i32 : i32, i32
  }
  func.func @transform_3(%arg0: i32, %arg1: i32, %arg2: memref<1xi32, #tpu.memory_space<smem>>) -> (i32, i32) {
    %c0_i32 = arith.constant 0 : i32
    %c0_i32_0 = arith.constant 0 : i32
    %c0_i32_1 = arith.constant 0 : i32
    return %c0_i32, %c0_i32_0 : i32, i32
  }
  func.func @transform_4(%arg0: i32, %arg1: i32, %arg2: memref<1xi32, #tpu.memory_space<smem>>) -> (i32, i32) {
    %c0_i32 = arith.constant 0 : i32
    %c0_i32_0 = arith.constant 0 : i32
    %c0_i32_1 = arith.constant 0 : i32
    return %c0_i32, %c0_i32_0 : i32, i32
  }
  func.func @transform_5(%arg0: i32, %arg1: i32, %arg2: memref<1xi32, #tpu.memory_space<smem>>) -> (i32, i32, i32) {
    %c0_i32 = arith.constant 0 : i32
    %c0_i32_0 = arith.constant 0 : i32
    return %arg1, %arg0, %c0_i32 : i32, i32, i32
  }
  func.func @transform_6(%arg0: i32, %arg1: i32, %arg2: memref<1xi32, #tpu.memory_space<smem>>) -> (i32, i32, i32) {
    %c0_i32 = arith.constant 0 : i32
    %0 = arith.subi %c0_i32, %arg1 : i32
    %c0_i32_0 = arith.constant 0 : i32
    %c0_i32_1 = arith.constant 0 : i32
    return %0, %arg0, %c0_i32_0 : i32, i32, i32
  }
}

module attributes {stable_mosaic.version = 11 : i64} {
  func.func @_ram_hops_kernel(%arg0: i32, %arg1: memref<2x8x64xbf16, #tpu.memory_space<vmem>>, %arg2: memref<2x8xf32, #tpu.memory_space<vmem>>, %arg3: memref<2x64xf32, #tpu.memory_space<vmem>>, %arg4: memref<64x64xf32, #tpu.memory_space<vmem>>, %arg5: memref<1x64xf32, #tpu.memory_space<vmem>>, %arg6: memref<1x64xf32, #tpu.memory_space<vmem>>, %arg7: memref<64x192xf32, #tpu.memory_space<vmem>>, %arg8: memref<1x192xf32, #tpu.memory_space<vmem>>, %arg9: memref<64x192xf32, #tpu.memory_space<vmem>>, %arg10: memref<1x192xf32, #tpu.memory_space<vmem>>, %arg11: memref<2x64xf32, #tpu.memory_space<vmem>>) attributes {dimension_semantics = [#tpu.dimension_semantics<parallel>], iteration_bounds = array<i64: 1>, scalar_prefetch = 0 : i64, scratch_operands = 0 : i64, tpu.core_type = #tpu.core_type<tc>, window_params = [{transform_indices = @transform_0, window_bounds = array<i64: 2, 8, 64>}, {transform_indices = @transform_1, window_bounds = array<i64: 2, 8>}, {transform_indices = @transform_2, window_bounds = array<i64: 2, 64>}, {pipeline_mode = #tpu.pipeline_mode<synchronous>, transform_indices = @transform_3, window_bounds = array<i64: 64, 64>}, {pipeline_mode = #tpu.pipeline_mode<synchronous>, transform_indices = @transform_4, window_bounds = array<i64: 1, 64>}, {pipeline_mode = #tpu.pipeline_mode<synchronous>, transform_indices = @transform_5, window_bounds = array<i64: 1, 64>}, {pipeline_mode = #tpu.pipeline_mode<synchronous>, transform_indices = @transform_6, window_bounds = array<i64: 64, 192>}, {pipeline_mode = #tpu.pipeline_mode<synchronous>, transform_indices = @transform_7, window_bounds = array<i64: 1, 192>}, {pipeline_mode = #tpu.pipeline_mode<synchronous>, transform_indices = @transform_8, window_bounds = array<i64: 64, 192>}, {pipeline_mode = #tpu.pipeline_mode<synchronous>, transform_indices = @transform_9, window_bounds = array<i64: 1, 192>}, {transform_indices = @transform_10, window_bounds = array<i64: 2, 64>}]} {
    %c0 = arith.constant 0 : index
    %c0_0 = arith.constant 0 : index
    %c0_1 = arith.constant 0 : index
    %0 = vector.load %arg1[%c0, %c0_0, %c0_1] : memref<2x8x64xbf16, #tpu.memory_space<vmem>>, vector<2x8x64xbf16>
    %1 = arith.extf %0 : vector<2x8x64xbf16> to vector<2x8x64xf32>
    %c0_2 = arith.constant 0 : index
    %c0_3 = arith.constant 0 : index
    %2 = vector.load %arg2[%c0_2, %c0_3] : memref<2x8xf32, #tpu.memory_space<vmem>>, vector<2x8xf32>
    %c0_4 = arith.constant 0 : index
    %c0_5 = arith.constant 0 : index
    %3 = vector.load %arg3[%c0_4, %c0_5] : memref<2x64xf32, #tpu.memory_space<vmem>>, vector<2x64xf32>
    %c0_6 = arith.constant 0 : index
    %c0_7 = arith.constant 0 : index
    %4 = vector.load %arg4[%c0_6, %c0_7] : memref<64x64xf32, #tpu.memory_space<vmem>>, vector<64x64xf32>
    %c0_8 = arith.constant 0 : index
    %c0_9 = arith.constant 0 : index
    %5 = vector.load %arg5[%c0_8, %c0_9] : memref<1x64xf32, #tpu.memory_space<vmem>>, vector<1x64xf32>
    %c0_10 = arith.constant 0 : index
    %c0_11 = arith.constant 0 : index
    %6 = vector.load %arg6[%c0_10, %c0_11] : memref<1x64xf32, #tpu.memory_space<vmem>>, vector<1x64xf32>
    %c0_12 = arith.constant 0 : index
    %c0_13 = arith.constant 0 : index
    %7 = vector.load %arg7[%c0_12, %c0_13] : memref<64x192xf32, #tpu.memory_space<vmem>>, vector<64x192xf32>
    %c0_14 = arith.constant 0 : index
    %c0_15 = arith.constant 0 : index
    %8 = vector.load %arg8[%c0_14, %c0_15] : memref<1x192xf32, #tpu.memory_space<vmem>>, vector<1x192xf32>
    %c0_16 = arith.constant 0 : index
    %c0_17 = arith.constant 0 : index
    %9 = vector.load %arg9[%c0_16, %c0_17] : memref<64x192xf32, #tpu.memory_space<vmem>>, vector<64x192xf32>
    %c0_18 = arith.constant 0 : index
    %c0_19 = arith.constant 0 : index
    %10 = vector.load %arg10[%c0_18, %c0_19] : memref<1x192xf32, #tpu.memory_space<vmem>>, vector<1x192xf32>
    %cst = arith.constant dense<0.000000e+00> : vector<2x64xf32>
    %11 = tpu.matmul %3, %4, %cst {dimension_numbers = #tpu.dot_dimension_numbers<[1], [0], [0], [1], [0, 0, 1, 1], [], []>} : vector<2x64xf32>, vector<64x64xf32>, vector<2x64xf32> -> vector<2x64xf32>
    %12 = vector.broadcast %5 : vector<1x64xf32> to vector<2x64xf32>
    %13 = arith.addf %11, %12 : vector<2x64xf32>
    %14 = vector.broadcast %6 : vector<1x64xf32> to vector<2x64xf32>
    %15 = arith.mulf %13, %14 : vector<2x64xf32>
    %cst_20 = arith.constant dense<0.000000e+00> : vector<2xf32>
    %16 = vector.multi_reduction <add>, %15, %cst_20 [1] : vector<2x64xf32> to vector<2xf32>
    %17 = vector.shape_cast %16 : vector<2xf32> to vector<2x1xf32>
    %18 = vector.broadcast %17 : vector<2x1xf32> to vector<2x8xf32>
    %19 = arith.addf %2, %18 : vector<2x8xf32>
    %20 = math.tanh %19 : vector<2x8xf32>
    %cst_21 = arith.constant dense<0xFF800000> : vector<2xf32>
    %21 = vector.multi_reduction <maximumf>, %20, %cst_21 [1] : vector<2x8xf32> to vector<2xf32>
    %22 = vector.shape_cast %21 : vector<2xf32> to vector<2x1xf32>
    %23 = vector.broadcast %22 : vector<2x1xf32> to vector<2x8xf32>
    %24 = arith.subf %20, %23 : vector<2x8xf32>
    %25 = math.exp %24 : vector<2x8xf32>
    %cst_22 = arith.constant dense<0.000000e+00> : vector<2xf32>
    %26 = vector.multi_reduction <add>, %25, %cst_22 [1] : vector<2x8xf32> to vector<2xf32>
    %27 = vector.shape_cast %26 : vector<2xf32> to vector<2x1xf32>
    %28 = vector.broadcast %27 : vector<2x1xf32> to vector<2x8xf32>
    %29 = arith.divf %25, %28 : vector<2x8xf32>
    %30 = vector.shape_cast %29 : vector<2x8xf32> to vector<2x8x1xf32>
    %31 = vector.broadcast %30 : vector<2x8x1xf32> to vector<2x8x64xf32>
    %32 = arith.mulf %31, %1 : vector<2x8x64xf32>
    %cst_23 = arith.constant dense<0.000000e+00> : vector<2x64xf32>
    %33 = vector.multi_reduction <add>, %32, %cst_23 [1] : vector<2x8x64xf32> to vector<2x64xf32>
    %cst_24 = arith.constant dense<0.000000e+00> : vector<2x192xf32>
    %34 = tpu.matmul %33, %7, %cst_24 {dimension_numbers = #tpu.dot_dimension_numbers<[1], [0], [0], [1], [0, 0, 1, 1], [], []>} : vector<2x64xf32>, vector<64x192xf32>, vector<2x192xf32> -> vector<2x192xf32>
    %35 = vector.broadcast %8 : vector<1x192xf32> to vector<2x192xf32>
    %36 = arith.addf %34, %35 : vector<2x192xf32>
    %cst_25 = arith.constant dense<0.000000e+00> : vector<2x192xf32>
    %37 = tpu.matmul %3, %9, %cst_25 {dimension_numbers = #tpu.dot_dimension_numbers<[1], [0], [0], [1], [0, 0, 1, 1], [], []>} : vector<2x64xf32>, vector<64x192xf32>, vector<2x192xf32> -> vector<2x192xf32>
    %38 = vector.broadcast %10 : vector<1x192xf32> to vector<2x192xf32>
    %39 = arith.addf %37, %38 : vector<2x192xf32>
    %40 = vector.extract_strided_slice %36 {offsets = [0, 0], sizes = [2, 64], strides = [1, 1]} : vector<2x192xf32> to vector<2x64xf32>
    %41 = vector.extract_strided_slice %39 {offsets = [0, 0], sizes = [2, 64], strides = [1, 1]} : vector<2x192xf32> to vector<2x64xf32>
    %42 = arith.addf %40, %41 : vector<2x64xf32>
    %43 = arith.negf %42 : vector<2x64xf32>
    %44 = math.exp %43 : vector<2x64xf32>
    %cst_26 = arith.constant 1.000000e+00 : f32
    %45 = vector.broadcast %cst_26 : f32 to vector<2x64xf32>
    %46 = arith.addf %45, %44 : vector<2x64xf32>
    %47 = arith.divf %45, %46 : vector<2x64xf32>
    %48 = vector.extract_strided_slice %36 {offsets = [0, 64], sizes = [2, 64], strides = [1, 1]} : vector<2x192xf32> to vector<2x64xf32>
    %49 = vector.extract_strided_slice %39 {offsets = [0, 64], sizes = [2, 64], strides = [1, 1]} : vector<2x192xf32> to vector<2x64xf32>
    %50 = arith.addf %48, %49 : vector<2x64xf32>
    %51 = arith.negf %50 : vector<2x64xf32>
    %52 = math.exp %51 : vector<2x64xf32>
    %cst_27 = arith.constant 1.000000e+00 : f32
    %53 = vector.broadcast %cst_27 : f32 to vector<2x64xf32>
    %54 = arith.addf %53, %52 : vector<2x64xf32>
    %55 = arith.divf %53, %54 : vector<2x64xf32>
    %56 = vector.extract_strided_slice %36 {offsets = [0, 128], sizes = [2, 64], strides = [1, 1]} : vector<2x192xf32> to vector<2x64xf32>
    %57 = vector.extract_strided_slice %39 {offsets = [0, 128], sizes = [2, 64], strides = [1, 1]} : vector<2x192xf32> to vector<2x64xf32>
    %58 = arith.mulf %47, %57 : vector<2x64xf32>
    %59 = arith.addf %56, %58 : vector<2x64xf32>
    %60 = math.tanh %59 : vector<2x64xf32>
    %cst_28 = arith.constant 1.000000e+00 : f32
    %61 = vector.broadcast %cst_28 : f32 to vector<2x64xf32>
    %62 = arith.subf %61, %55 : vector<2x64xf32>
    %63 = arith.mulf %62, %60 : vector<2x64xf32>
    %64 = arith.mulf %55, %3 : vector<2x64xf32>
    %65 = arith.addf %63, %64 : vector<2x64xf32>
    %cst_29 = arith.constant dense<0.000000e+00> : vector<2x64xf32>
    %66 = tpu.matmul %65, %4, %cst_29 {dimension_numbers = #tpu.dot_dimension_numbers<[1], [0], [0], [1], [0, 0, 1, 1], [], []>} : vector<2x64xf32>, vector<64x64xf32>, vector<2x64xf32> -> vector<2x64xf32>
    %67 = vector.broadcast %5 : vector<1x64xf32> to vector<2x64xf32>
    %68 = arith.addf %66, %67 : vector<2x64xf32>
    %69 = vector.broadcast %6 : vector<1x64xf32> to vector<2x64xf32>
    %70 = arith.mulf %68, %69 : vector<2x64xf32>
    %cst_30 = arith.constant dense<0.000000e+00> : vector<2xf32>
    %71 = vector.multi_reduction <add>, %70, %cst_30 [1] : vector<2x64xf32> to vector<2xf32>
    %72 = vector.shape_cast %71 : vector<2xf32> to vector<2x1xf32>
    %73 = vector.broadcast %72 : vector<2x1xf32> to vector<2x8xf32>
    %74 = arith.addf %2, %73 : vector<2x8xf32>
    %75 = math.tanh %74 : vector<2x8xf32>
    %cst_31 = arith.constant dense<0xFF800000> : vector<2xf32>
    %76 = vector.multi_reduction <maximumf>, %75, %cst_31 [1] : vector<2x8xf32> to vector<2xf32>
    %77 = vector.shape_cast %76 : vector<2xf32> to vector<2x1xf32>
    %78 = vector.broadcast %77 : vector<2x1xf32> to vector<2x8xf32>
    %79 = arith.subf %75, %78 : vector<2x8xf32>
    %80 = math.exp %79 : vector<2x8xf32>
    %cst_32 = arith.constant dense<0.000000e+00> : vector<2xf32>
    %81 = vector.multi_reduction <add>, %80, %cst_32 [1] : vector<2x8xf32> to vector<2xf32>
    %82 = vector.shape_cast %81 : vector<2xf32> to vector<2x1xf32>
    %83 = vector.broadcast %82 : vector<2x1xf32> to vector<2x8xf32>
    %84 = arith.divf %80, %83 : vector<2x8xf32>
    %85 = vector.shape_cast %84 : vector<2x8xf32> to vector<2x8x1xf32>
    %86 = vector.broadcast %85 : vector<2x8x1xf32> to vector<2x8x64xf32>
    %87 = arith.mulf %86, %1 : vector<2x8x64xf32>
    %cst_33 = arith.constant dense<0.000000e+00> : vector<2x64xf32>
    %88 = vector.multi_reduction <add>, %87, %cst_33 [1] : vector<2x8x64xf32> to vector<2x64xf32>
    %cst_34 = arith.constant dense<0.000000e+00> : vector<2x192xf32>
    %89 = tpu.matmul %88, %7, %cst_34 {dimension_numbers = #tpu.dot_dimension_numbers<[1], [0], [0], [1], [0, 0, 1, 1], [], []>} : vector<2x64xf32>, vector<64x192xf32>, vector<2x192xf32> -> vector<2x192xf32>
    %90 = vector.broadcast %8 : vector<1x192xf32> to vector<2x192xf32>
    %91 = arith.addf %89, %90 : vector<2x192xf32>
    %cst_35 = arith.constant dense<0.000000e+00> : vector<2x192xf32>
    %92 = tpu.matmul %65, %9, %cst_35 {dimension_numbers = #tpu.dot_dimension_numbers<[1], [0], [0], [1], [0, 0, 1, 1], [], []>} : vector<2x64xf32>, vector<64x192xf32>, vector<2x192xf32> -> vector<2x192xf32>
    %93 = vector.broadcast %10 : vector<1x192xf32> to vector<2x192xf32>
    %94 = arith.addf %92, %93 : vector<2x192xf32>
    %95 = vector.extract_strided_slice %91 {offsets = [0, 0], sizes = [2, 64], strides = [1, 1]} : vector<2x192xf32> to vector<2x64xf32>
    %96 = vector.extract_strided_slice %94 {offsets = [0, 0], sizes = [2, 64], strides = [1, 1]} : vector<2x192xf32> to vector<2x64xf32>
    %97 = arith.addf %95, %96 : vector<2x64xf32>
    %98 = arith.negf %97 : vector<2x64xf32>
    %99 = math.exp %98 : vector<2x64xf32>
    %cst_36 = arith.constant 1.000000e+00 : f32
    %100 = vector.broadcast %cst_36 : f32 to vector<2x64xf32>
    %101 = arith.addf %100, %99 : vector<2x64xf32>
    %102 = arith.divf %100, %101 : vector<2x64xf32>
    %103 = vector.extract_strided_slice %91 {offsets = [0, 64], sizes = [2, 64], strides = [1, 1]} : vector<2x192xf32> to vector<2x64xf32>
    %104 = vector.extract_strided_slice %94 {offsets = [0, 64], sizes = [2, 64], strides = [1, 1]} : vector<2x192xf32> to vector<2x64xf32>
    %105 = arith.addf %103, %104 : vector<2x64xf32>
    %106 = arith.negf %105 : vector<2x64xf32>
    %107 = math.exp %106 : vector<2x64xf32>
    %cst_37 = arith.constant 1.000000e+00 : f32
    %108 = vector.broadcast %cst_37 : f32 to vector<2x64xf32>
    %109 = arith.addf %108, %107 : vector<2x64xf32>
    %110 = arith.divf %108, %109 : vector<2x64xf32>
    %111 = vector.extract_strided_slice %91 {offsets = [0, 128], sizes = [2, 64], strides = [1, 1]} : vector<2x192xf32> to vector<2x64xf32>
    %112 = vector.extract_strided_slice %94 {offsets = [0, 128], sizes = [2, 64], strides = [1, 1]} : vector<2x192xf32> to vector<2x64xf32>
    %113 = arith.mulf %102, %112 : vector<2x64xf32>
    %114 = arith.addf %111, %113 : vector<2x64xf32>
    %115 = math.tanh %114 : vector<2x64xf32>
    %cst_38 = arith.constant 1.000000e+00 : f32
    %116 = vector.broadcast %cst_38 : f32 to vector<2x64xf32>
    %117 = arith.subf %116, %110 : vector<2x64xf32>
    %118 = arith.mulf %117, %115 : vector<2x64xf32>
    %119 = arith.mulf %110, %65 : vector<2x64xf32>
    %120 = arith.addf %118, %119 : vector<2x64xf32>
    %cst_39 = arith.constant dense<0.000000e+00> : vector<2x64xf32>
    %121 = tpu.matmul %120, %4, %cst_39 {dimension_numbers = #tpu.dot_dimension_numbers<[1], [0], [0], [1], [0, 0, 1, 1], [], []>} : vector<2x64xf32>, vector<64x64xf32>, vector<2x64xf32> -> vector<2x64xf32>
    %122 = vector.broadcast %5 : vector<1x64xf32> to vector<2x64xf32>
    %123 = arith.addf %121, %122 : vector<2x64xf32>
    %124 = vector.broadcast %6 : vector<1x64xf32> to vector<2x64xf32>
    %125 = arith.mulf %123, %124 : vector<2x64xf32>
    %cst_40 = arith.constant dense<0.000000e+00> : vector<2xf32>
    %126 = vector.multi_reduction <add>, %125, %cst_40 [1] : vector<2x64xf32> to vector<2xf32>
    %127 = vector.shape_cast %126 : vector<2xf32> to vector<2x1xf32>
    %128 = vector.broadcast %127 : vector<2x1xf32> to vector<2x8xf32>
    %129 = arith.addf %2, %128 : vector<2x8xf32>
    %130 = math.tanh %129 : vector<2x8xf32>
    %cst_41 = arith.constant dense<0xFF800000> : vector<2xf32>
    %131 = vector.multi_reduction <maximumf>, %130, %cst_41 [1] : vector<2x8xf32> to vector<2xf32>
    %132 = vector.shape_cast %131 : vector<2xf32> to vector<2x1xf32>
    %133 = vector.broadcast %132 : vector<2x1xf32> to vector<2x8xf32>
    %134 = arith.subf %130, %133 : vector<2x8xf32>
    %135 = math.exp %134 : vector<2x8xf32>
    %cst_42 = arith.constant dense<0.000000e+00> : vector<2xf32>
    %136 = vector.multi_reduction <add>, %135, %cst_42 [1] : vector<2x8xf32> to vector<2xf32>
    %137 = vector.shape_cast %136 : vector<2xf32> to vector<2x1xf32>
    %138 = vector.broadcast %137 : vector<2x1xf32> to vector<2x8xf32>
    %139 = arith.divf %135, %138 : vector<2x8xf32>
    %140 = vector.shape_cast %139 : vector<2x8xf32> to vector<2x8x1xf32>
    %141 = vector.broadcast %140 : vector<2x8x1xf32> to vector<2x8x64xf32>
    %142 = arith.mulf %141, %1 : vector<2x8x64xf32>
    %cst_43 = arith.constant dense<0.000000e+00> : vector<2x64xf32>
    %143 = vector.multi_reduction <add>, %142, %cst_43 [1] : vector<2x8x64xf32> to vector<2x64xf32>
    %cst_44 = arith.constant dense<0.000000e+00> : vector<2x192xf32>
    %144 = tpu.matmul %143, %7, %cst_44 {dimension_numbers = #tpu.dot_dimension_numbers<[1], [0], [0], [1], [0, 0, 1, 1], [], []>} : vector<2x64xf32>, vector<64x192xf32>, vector<2x192xf32> -> vector<2x192xf32>
    %145 = vector.broadcast %8 : vector<1x192xf32> to vector<2x192xf32>
    %146 = arith.addf %144, %145 : vector<2x192xf32>
    %cst_45 = arith.constant dense<0.000000e+00> : vector<2x192xf32>
    %147 = tpu.matmul %120, %9, %cst_45 {dimension_numbers = #tpu.dot_dimension_numbers<[1], [0], [0], [1], [0, 0, 1, 1], [], []>} : vector<2x64xf32>, vector<64x192xf32>, vector<2x192xf32> -> vector<2x192xf32>
    %148 = vector.broadcast %10 : vector<1x192xf32> to vector<2x192xf32>
    %149 = arith.addf %147, %148 : vector<2x192xf32>
    %150 = vector.extract_strided_slice %146 {offsets = [0, 0], sizes = [2, 64], strides = [1, 1]} : vector<2x192xf32> to vector<2x64xf32>
    %151 = vector.extract_strided_slice %149 {offsets = [0, 0], sizes = [2, 64], strides = [1, 1]} : vector<2x192xf32> to vector<2x64xf32>
    %152 = arith.addf %150, %151 : vector<2x64xf32>
    %153 = arith.negf %152 : vector<2x64xf32>
    %154 = math.exp %153 : vector<2x64xf32>
    %cst_46 = arith.constant 1.000000e+00 : f32
    %155 = vector.broadcast %cst_46 : f32 to vector<2x64xf32>
    %156 = arith.addf %155, %154 : vector<2x64xf32>
    %157 = arith.divf %155, %156 : vector<2x64xf32>
    %158 = vector.extract_strided_slice %146 {offsets = [0, 64], sizes = [2, 64], strides = [1, 1]} : vector<2x192xf32> to vector<2x64xf32>
    %159 = vector.extract_strided_slice %149 {offsets = [0, 64], sizes = [2, 64], strides = [1, 1]} : vector<2x192xf32> to vector<2x64xf32>
    %160 = arith.addf %158, %159 : vector<2x64xf32>
    %161 = arith.negf %160 : vector<2x64xf32>
    %162 = math.exp %161 : vector<2x64xf32>
    %cst_47 = arith.constant 1.000000e+00 : f32
    %163 = vector.broadcast %cst_47 : f32 to vector<2x64xf32>
    %164 = arith.addf %163, %162 : vector<2x64xf32>
    %165 = arith.divf %163, %164 : vector<2x64xf32>
    %166 = vector.extract_strided_slice %146 {offsets = [0, 128], sizes = [2, 64], strides = [1, 1]} : vector<2x192xf32> to vector<2x64xf32>
    %167 = vector.extract_strided_slice %149 {offsets = [0, 128], sizes = [2, 64], strides = [1, 1]} : vector<2x192xf32> to vector<2x64xf32>
    %168 = arith.mulf %157, %167 : vector<2x64xf32>
    %169 = arith.addf %166, %168 : vector<2x64xf32>
    %170 = math.tanh %169 : vector<2x64xf32>
    %cst_48 = arith.constant 1.000000e+00 : f32
    %171 = vector.broadcast %cst_48 : f32 to vector<2x64xf32>
    %172 = arith.subf %171, %165 : vector<2x64xf32>
    %173 = arith.mulf %172, %170 : vector<2x64xf32>
    %174 = arith.mulf %165, %120 : vector<2x64xf32>
    %175 = arith.addf %173, %174 : vector<2x64xf32>
    %c0_49 = arith.constant 0 : index
    %c0_50 = arith.constant 0 : index
    %176 = vector.load %arg11[%c0_49, %c0_50] : memref<2x64xf32, #tpu.memory_space<vmem>>, vector<2x64xf32>
    tpu.vector_store %arg11[%c0_49, %c0_50], %175 {strides = array<i32>} : memref<2x64xf32, #tpu.memory_space<vmem>>, vector<2x64xf32>,
    return
  }
  func.func @transform_0(%arg0: i32) -> (i32, i32, i32) {
    %c0_i32 = arith.constant 0 : i32
    %c0_i32_0 = arith.constant 0 : i32
    %c0_i32_1 = arith.constant 0 : i32
    return %arg0, %c0_i32, %c0_i32_0 : i32, i32, i32
  }
  func.func @transform_1(%arg0: i32) -> (i32, i32) {
    %c0_i32 = arith.constant 0 : i32
    %c0_i32_0 = arith.constant 0 : i32
    return %arg0, %c0_i32 : i32, i32
  }
  func.func @transform_2(%arg0: i32) -> (i32, i32) {
    %c0_i32 = arith.constant 0 : i32
    %c0_i32_0 = arith.constant 0 : i32
    return %arg0, %c0_i32 : i32, i32
  }
  func.func @transform_3(%arg0: i32) -> (i32, i32) {
    %c0_i32 = arith.constant 0 : i32
    %c0_i32_0 = arith.constant 0 : i32
    %c0_i32_1 = arith.constant 0 : i32
    return %c0_i32, %c0_i32_0 : i32, i32
  }
  func.func @transform_4(%arg0: i32) -> (i32, i32) {
    %c0_i32 = arith.constant 0 : i32
    %c0_i32_0 = arith.constant 0 : i32
    %c0_i32_1 = arith.constant 0 : i32
    return %c0_i32, %c0_i32_0 : i32, i32
  }
  func.func @transform_5(%arg0: i32) -> (i32, i32) {
    %c0_i32 = arith.constant 0 : i32
    %c0_i32_0 = arith.constant 0 : i32
    %c0_i32_1 = arith.constant 0 : i32
    return %c0_i32, %c0_i32_0 : i32, i32
  }
  func.func @transform_6(%arg0: i32) -> (i32, i32) {
    %c0_i32 = arith.constant 0 : i32
    %c0_i32_0 = arith.constant 0 : i32
    %c0_i32_1 = arith.constant 0 : i32
    return %c0_i32, %c0_i32_0 : i32, i32
  }
  func.func @transform_7(%arg0: i32) -> (i32, i32) {
    %c0_i32 = arith.constant 0 : i32
    %c0_i32_0 = arith.constant 0 : i32
    %c0_i32_1 = arith.constant 0 : i32
    return %c0_i32, %c0_i32_0 : i32, i32
  }
  func.func @transform_8(%arg0: i32) -> (i32, i32) {
    %c0_i32 = arith.constant 0 : i32
    %c0_i32_0 = arith.constant 0 : i32
    %c0_i32_1 = arith.constant 0 : i32
    return %c0_i32, %c0_i32_0 : i32, i32
  }
  func.func @transform_9(%arg0: i32) -> (i32, i32) {
    %c0_i32 = arith.constant 0 : i32
    %c0_i32_0 = arith.constant 0 : i32
    %c0_i32_1 = arith.constant 0 : i32
    return %c0_i32, %c0_i32_0 : i32, i32
  }
  func.func @transform_10(%arg0: i32) -> (i32, i32) {
    %c0_i32 = arith.constant 0 : i32
    %c0_i32_0 = arith.constant 0 : i32
    return %arg0, %c0_i32 : i32, i32
  }
}

</mosaic_0001>

<bundles_post_ra>
// kernel: ram_forward.4
= control target key start
LH: loop header
LB: loop body
LE: loop exit
PB: predicated region body
PF: predicated region fallthrough
CT: control target
= control target key end

     0   :  { %vm61_vm0 = vcmask 254976   ;;  %v483_v0 = vmov 0.0   ;;  %s717_s0 = inlined_call_operand.<no memory space> [shape: s32[1], index: 0, kind: input, shape index: {}]   ;;  %s718_s1 = inlined_call_operand.vmem [shape: bf16[4,2,128], index: 1, kind: input, shape index: {}]   ;;  %s719_s2 = inlined_call_operand.vmem [shape: bf16[4,2,128], index: 2, kind: input, shape index: {}]   ;;  %s720_s3 = inlined_call_operand.vmem [shape: s32[2,1], index: 3, kind: input, shape index: {}]   ;;  %s721_s4 = inlined_call_operand.vmem [shape: f32[32,128], index: 4, kind: input, shape index: {}]   ;;  %s722_s5 = inlined_call_operand.vmem [shape: f32[32,128], index: 5, kind: input, shape index: {}]   ;;  %s723_s6 = inlined_call_operand.vmem [shape: f32[4,2,32], index: 6, kind: output, shape index: {0}]   ;;  %s724_s7 = inlined_call_operand.vmem [shape: f32[4,2,32], index: 7, kind: output, shape index: {1}]  }
   0x1   :  { %62 = vst.msk [vmem:[#allocation2] sm:$0x3] %vm61_vm0, %v483_v0  ;;  %p70_p0 = scmp.gt.s32.totalorder %s717_s0, 0 }
   0x2   :  { %63 = vst.msk [vmem:[#allocation3] sm:$0x3] %vm61_vm0, %v483_v0 }
   0x3   :  { %64 = vst.msk [vmem:[#allocation4] sm:$0x3] %vm61_vm0, %v483_v0  ;;  %p535_p1 = por %p70_p0, %p70_p0 }
   0x4   :  { %65 = vst.msk [vmem:[#allocation5] sm:$0x3] %vm61_vm0, %v483_v0  ;;  %v545_v1 = vld [vmem:[%s720_s3] sm:$0x3] (%p535_p1)  ;;  %v555_v3 = vld [vmem:[%s721_s4 + $0x8] sm:$0xff] (%p535_p1)  ;;  %v560_v4 = vld [vmem:[%s721_s4 + $0x10] sm:$0xff] (%p535_p1) }
   0x5   :  { %75 = sbr.rel (!%p535_p1) target bundleno = 677 (0x2a5), region = 29  ;;  %v550_v2 = vld [vmem:[%s721_s4] sm:$0xff] (%p535_p1)  ;;  %v565_v5 = vld [vmem:[%s721_s4 + $0x18] sm:$0xff] (%p535_p1)  ;;  %v575_v7 = vld [vmem:[%s722_s5 + $0x8] sm:$0xff] (%p535_p1)  ;;  %s595_s4 = smov (%p535_p1), 0  }
   0x6   :  { %v570_v6 = vld [vmem:[%s722_s5] sm:$0xff] (%p535_p1)  ;;  %v580_v8 = vld [vmem:[%s722_s5 + $0x10] sm:$0xff] (%p535_p1)  ;;  %v585_v9 = vld [vmem:[%s722_s5 + $0x18] sm:$0xff] (%p535_p1) }
   0x8   :  { %v85_v10 = vld [vmem:[#allocation2] sm:$0x3] (%p535_p1)  }
   0x9   :  { %v86_v11 = vld [vmem:[#allocation3] sm:$0x3] (%p535_p1)  }
   0xa   :  { %v87_v12 = vld [vmem:[#allocation4] sm:$0x3]  }
   0xb   :  { %v88_v13 = vld [vmem:[#allocation5] sm:$0x3]  }
   0xc LB: > { %121 = vmatpush.msra.mxu0 %v565_v5  ;;  %148 = vmatpush.msra.mxu1 %v585_v9  ;;  %s484_s5 = smov 32   ;;  %vm105_vm1 = vcmask 261120   ;;  %s102_s22 = scalar_lea.vmem %s718_s1, %s481_s4  ;;  %s481_s4 = sphi %s595_s4, %s94_s4   ;;  %v477_v10 = vphi %v85_v10, %v729_v10   ;;  %v473_v11 = vphi %v86_v11, %v728_v11   ;;  %v469_v12 = vphi %v87_v12, %v727_v12   ;;  %v465_v13 = vphi %v88_v13, %v726_v13  }
   0xd   : > { %178 = vrot.lane.b32.xlu1 %v473_v11, %s484_s5  ;;  %219 = vrot.lane.b32.xlu2 %v465_v13, %s484_s5  ;;  %s631_s23 = ssub.s32 3, %s481_s4  ;;  %v103_v14 = vld [vmem:[%s102_s22] sm:$0x1]  ;;  %s485_s28 = smov 64  }
   0xe   : > { %122 = vmatpush.msra.mxu0 %v560_v4  ;;  %149 = vmatpush.msra.mxu1 %v580_v8  ;;  %s130_s27 = scalar_lea.vmem %s719_s2, %s631_s23  ;;  %v104_v15 = vunpack.c.l.bf16 %v103_v14  ;;  %v241_v0 = vstv %s631_s23  ;;  %v486_v14 = vmov 0   ;;  %s487_s29 = smov 96  }
   0xf   : > { %v131_v16 = vld [vmem:[%s130_s27] sm:$0x1]  ;;  %vm242_vm10 = vcmp.gt.s32.totalorder %v545_v1, %v241_v0  ;;  %426 = vset.pattern.permute.xlu0 %v486_v14  ;;  %425 = vset.pattern.permute.xlu2 %v486_v14  ;;  %s378_s0 = sshll.u32 %s631_s23, 1  ;;  %s377_s10 = sshll.u32 %s481_s4, 1 }
  0x10   : > { %123 = vmatpush.msra.mxu0 %v555_v3  ;;  %150 = vmatpush.msra.mxu1 %v575_v7  ;;  %v132_v19 = vunpack.c.l.bf16 %v131_v16  ;;  %v239_v16 = vstv %s481_s4  ;;  %s298_s9 = scalar_lea.vmem %s724_s7, %s378_s0  ;;  %s288_s3 = scalar_lea.vmem %s723_s6, %s377_s10 }
  0x11   : > { %vm240_vm11 = vcmp.gt.s32.totalorder %v545_v1, %v239_v16  ;;  %s94_s4 = sadd.s32 1, %s481_s4  }
  0x12   : > { %124 = vmatpush.msra.mxu0 %v550_v2  ;;  %151 = vmatpush.msra.mxu1 %v570_v6  ;;  %p91_p2 = scmp.ge.s32.totalorder %s94_s4, 4  }
  0x13   : > { %373 = vmatmul.msk.f32.vlgmr.msra.gmra.mxu0 %vm105_vm1, %v477_v10  ;;  %374 = vmatmul.msk.f32.vlgmr.msra.gmra.mxu1 %vm105_vm1, %v469_v12 }
  0x67   : > { %v220_v54 = vpop.permute.xlu2 %219 }
  0x7f   : > { %v179_v58 = vpop.permute.xlu1 %178 }
  0x90   : > { %v126_v17 = vpop.f32.mrf.mxu0  ;;  %v153_v20 = vpop.f32.mrf.mxu1 }
  0x91   : > { %v129_v18 = vadd.f32 %v126_v17, %v104_v15  ;;  %v156_v21 = vadd.f32 %v153_v20, %v132_v19  ;;  %v262_v15 = vsel %vm242_vm10, 1, %v486_v14  ;;  %v243_v19 = vsel %vm240_vm11, 1, %v486_v14 }
  0x93   : > { %427 = vtanh.f32 %v129_v18  ;;  %v375_v24 = vmul.f32 -1.442695, %v129_v18  ;;  %v376_v25 = vmul.f32 -1.442695, %v156_v21 }
  0x94   : > { %429 = vtanh.f32 %v156_v21 }
  0x95   : > { %431 = vpow2.f32 %v375_v24 }
  0x96   : > { %433 = vpow2.f32 %v376_v25 }
  0x99   : > { %v428_v22 = vpop.eup %427 }
  0x9a   : > { %183 = vrot.lane.b32.xlu0 %v428_v22, %s485_s28  ;;  %v430_v23 = vpop.eup %429 }
  0x9b   : > { %v432_v26 = vpop.eup %431 }
  0x9c   : > { %v160_v27 = vadd.f32 1.0, %v432_v26  ;;  %v434_v28 = vpop.eup %433 }
  0x9d   : > { %v201_v29 = vadd.f32 1.0, %v434_v28 }
  0x9e   : > { %435 = vrcp.f32 %v160_v27  ;;  %v172_v38 = vand.u32 2147483648, %v160_v27  ;;  %vm166_vm3 = vweird.f32 %v160_v27  ;;  %v170_v39 = vand.u32 2147483647, %v160_v27 }
  0x9f   : > { %437 = vrcp.f32 %v201_v29  ;;  %vm207_vm6 = vweird.f32 %v201_v29  ;;  %v213_v44 = vand.u32 2147483648, %v201_v29  ;;  %v211_v47 = vand.u32 2147483647, %v201_v29 }
  0xa0   : > { %v173_v42 = vor.u32 1.1754944e-38, %v172_v38  ;;  %vm171_vm5 = vcmp.eq.f32.partialorder %v170_v39, 8.507059e+37 }
  0xa1   : > { %v214_v49 = vor.u32 1.1754944e-38, %v213_v44  ;;  %vm212_vm9 = vcmp.eq.f32.partialorder %v211_v47, 8.507059e+37 }
  0xa2   : > { %224 = vrot.lane.b32.xlu0 %v430_v23, %s485_s28 }
  0xa4   : > { %v436_v30 = vpop.eup %435 }
  0xa5   : > { %v162_v31 = vmul.f32 %v436_v30, %v160_v27  ;;  %v438_v33 = vpop.eup %437  ;;  %vm167_vm2 = vweird.f32 %v436_v30 }
  0xa6   : > { %v203_v35 = vmul.f32 %v438_v33, %v201_v29  ;;  %vm168_vm4 = vmor %vm166_vm3, %vm167_vm2  ;;  %vm208_vm7 = vweird.f32 %v438_v33 }
  0xa7   : > { %v163_v32 = vsub.f32 1.0, %v162_v31  ;;  %vm209_vm8 = vmor %vm207_vm6, %vm208_vm7 }
  0xa8   : > { %v204_v37 = vsub.f32 1.0, %v203_v35 }
  0xa9   : > { %v164_v34 = vmul.f32 %v436_v30, %v163_v32 }
  0xaa   : > { %v205_v41 = vmul.f32 %v438_v33, %v204_v37 }
  0xab   : > { %v165_v36 = vadd.f32 %v436_v30, %v164_v34 }
  0xac   : > { %v206_v46 = vadd.f32 %v438_v33, %v205_v41 }
  0xad   : > { %v169_v40 = vsel %vm168_vm4, %v436_v30, %v165_v36 }
  0xae   : > { %v174_v43 = vsel %vm171_vm5, %v173_v42, %v169_v40  ;;  %v210_v50 = vsel %vm209_vm8, %v438_v33, %v206_v46 }
  0xaf   : > { %v215_v51 = vsel %vm212_vm9, %v214_v49, %v210_v50  ;;  %v181_v60 = vmul.f32 %v179_v58, %v174_v43 }
  0xb0   : > { %v222_v55 = vmul.f32 %v220_v54, %v215_v51 }
 0x10c   : > { %v184_v45 = vpop.permute.xlu0 %183 }
 0x10d   : > { %v186_v48 = vmul.f32 %v184_v45, %v174_v43 }
 0x10f   : > { %188 = vrot.lane.b32.xlu1 %v186_v48, %s484_s5 }
 0x114   : > { %v225_v52 = vpop.permute.xlu0 %224 }
 0x115   : > { %v227_v53 = vmul.f32 %v225_v52, %v215_v51 }
 0x117   : > { %229 = vrot.lane.b32.xlu2 %v227_v53, %s484_s5 }
 0x11f   : > { %245 = vperm.xlu2 %425, %v243_v19  }
 0x171   : > { %v230_v56 = vpop.permute.xlu2 %229 }
 0x172   : > { %v232_v57 = vadd.f32 %v230_v56, %v222_v55 }
 0x174   : > { %439 = vtanh.f32 %v232_v57 }
 0x179   : > { %v246_v28 = vpop.permute.xlu2 %245 }
 0x17a   : > { %v440_v59 = vpop.eup %439  ;;  %vm247_vm12 = vcmp.eq.s32.totalorder %v246_v28, 1 }
 0x17b   : > { %235 = vrot.lane.b32.xlu1 %v440_v59, %s485_s28 }
 0x181   : > { %v189_v61 = vpop.permute.xlu1 %188 }
 0x182   : > { %v191_v62 = vadd.f32 %v189_v61, %v181_v60 }
 0x184   : > { %441 = vtanh.f32 %v191_v62 }
 0x18a   : > { %v442_v63 = vpop.eup %441 }
 0x18b   : > { %194 = vrot.lane.b32.xlu0 %v442_v63, %s485_s28 }
 0x193   : > { %264 = vperm.xlu0 %426, %v262_v15  }
 0x1ed   : > { %v236_v21 = vpop.permute.xlu1 %235 }
 0x1ee   : > { %v238_v22 = vmul.f32 %v236_v21, %v215_v51 }
 0x1fd   : > { %v195_v17 = vpop.permute.xlu0 %194 }
 0x1fe   : > { %v197_v18 = vmul.f32 %v195_v17, %v174_v43 }
 0x200   : > { %249 = vst [vmem:[#allocation1] ss:$4 sm:$0xff] %v197_v18 }
 0x205   : > { %v265_v31 = vpop.permute.xlu0 %264 }
 0x206   : > { %vm266_vm13 = vcmp.eq.s32.totalorder %v265_v31, 1 }
 0x207   : > { %v250_v20 = vld.sshfl [vmem:[#allocation1] sm:$0xff pattern:$0x73625140] }
 0x208   : > { %256 = vst [vmem:[#allocation1] ss:$4 sm:$0xff] %v191_v62  ;;  %251 = vrot.lane.b32.xlu1 %v250_v20, %s484_s5 }
 0x20f   : > { %v257_v23 = vld.sshfl [vmem:[#allocation1] sm:$0xff pattern:$0x73625140] }
 0x210   : > { %268 = vst [vmem:[#allocation1] ss:$4 sm:$0xff] %v238_v22 }
 0x217   : > { %v269_v24 = vld.sshfl [vmem:[#allocation1] sm:$0xff pattern:$0x73625140] }
 0x218   : > { %270 = vrot.lane.b32.xlu0 %v269_v24, %s484_s5  ;;  %275 = vst [vmem:[#allocation1] ss:$4 sm:$0xff] %v232_v57 }
 0x21f   : > { %v276_v25 = vld.sshfl [vmem:[#allocation1] sm:$0xff pattern:$0x73625140] }
 0x220   : > { %281 = vst [vmem:[#allocation1] ss:$4 sm:$0xff] %v197_v18 }
 0x227   : > { %v282_v26 = vld.sshfl [vmem:[#allocation1] sm:$0xff pattern:$0x73625140] }
 0x228   : > { %283 = vrot.lane.b32.xlu1 %v282_v26, %s484_s5  ;;  %291 = vst [vmem:[#allocation1] ss:$4 sm:$0xff] %v238_v22 }
 0x22f   : > { %v292_v27 = vld.sshfl [vmem:[#allocation1] sm:$0xff pattern:$0x73625140] }
 0x230   : > { %277 = vrot.lane.b32.xlu1 %v276_v25, %s487_s29  ;;  %293 = vrot.lane.b32.xlu2 %v292_v27, %s484_s5 }
 0x238   : > { %258 = vrot.lane.b32.xlu2 %v257_v23, %s487_s29 }
 0x27a   : > { %v252_v29 = vpop.permute.xlu1 %251 }
 0x27b   : > { %v254_v30 = vsel %vm247_vm12, %v252_v29, %v477_v10  }
 0x27c   :  { %301 = vst.msk [vmem:[#allocation2] sm:$0x3] (%p91_p2), %vm61_vm0, %v254_v30 }
 0x28a   : > { %v271_v32 = vpop.permute.xlu0 %270  ;;  %v294_v33 = vpop.permute.xlu2 %293 }
 0x28b   : > { %v273_v34 = vsel %vm266_vm13, %v271_v32, %v469_v12   ;;  %v296_v35 = vsel %vm266_vm13, %v294_v33, 0.0 }
 0x28c   : > { %299 = vst.msk [vmem:[%s298_s9] sm:$0x3] %vm61_vm0, %v296_v35  ;;  %v727_v12 = vmov %v273_v34 }
 0x28d   :  { %303 = vst.msk [vmem:[#allocation4] sm:$0x3] (%p91_p2), %vm61_vm0, %v273_v34 }
 0x292   : > { %v259_v36 = vpop.permute.xlu2 %258 }
 0x293   : > { %v261_v37 = vsel %vm247_vm12, %v259_v36, %v473_v11  }
 0x294   : > { %v728_v11 = vmov %v261_v37  ;;  %302 = vst.msk [vmem:[#allocation3] sm:$0x3] (%p91_p2), %vm61_vm0, %v261_v37 }
 0x29a   : > { %v284_v10 = vpop.permute.xlu1 %283 }
 0x29b   : > { %v286_v38 = vsel %vm247_vm12, %v284_v10, 0.0  ;;  %v729_v10 = vmov %v254_v30 }
 0x29c   : > { %290 = vst.msk [vmem:[%s288_s3] sm:$0x3] %vm61_vm0, %v286_v38 }
 0x2a0   :  { %93 = sbr.rel (!%p91_p2) target bundleno = 12 (0xc), region = 78 }
 0x2a2   : > { %v278_v39 = vpop.permute.xlu1 %277 }
 0x2a3   : > { %v280_v40 = vsel %vm266_vm13, %v278_v39, %v465_v13  }
 0x2a4   : > { %v726_v13 = vmov %v280_v40  ;;  %304 = vst.msk [vmem:[#allocation5] sm:$0x3] (%p91_p2), %vm61_vm0, %v280_v40 }
 0x2a5 PF:  { %307 = sbr.rel (%p535_p1) target bundleno = 691 (0x2b3), region = 40 }
 0x2aa   :  { %v488_v41 = vmov 0.0  }
 0x2ab   :  { %309 = vst.msk [vmem:[%s723_s6] sm:$0x3] %vm61_vm0, %v488_v41 }
 0x2ac   :  { %310 = vst.msk [vmem:[%s723_s6 + $0x2] sm:$0x3] %vm61_vm0, %v488_v41 }
 0x2ad   :  { %311 = vst.msk [vmem:[%s723_s6 + $0x4] sm:$0x3] %vm61_vm0, %v488_v41 }
 0x2ae   :  { %312 = vst.msk [vmem:[%s723_s6 + $0x6] sm:$0x3] %vm61_vm0, %v488_v41 }
 0x2af   :  { %313 = vst.msk [vmem:[%s724_s7] sm:$0x3] %vm61_vm0, %v488_v41 }
 0x2b0   :  { %314 = vst.msk [vmem:[%s724_s7 + $0x2] sm:$0x3] %vm61_vm0, %v488_v41 }
 0x2b1   :  { %315 = vst.msk [vmem:[%s724_s7 + $0x4] sm:$0x3] %vm61_vm0, %v488_v41 }
 0x2b2   :  { %316 = vst.msk [vmem:[%s724_s7 + $0x6] sm:$0x3] %vm61_vm0, %v488_v41 }
 0x2b3 PF:  {}

// kernel: ram_forward.3
= control target key start
LH: loop header
LB: loop body
LE: loop exit
PB: predicated region body
PF: predicated region fallthrough
CT: control target
= control target key end

     0   :  { %vm61_vm0 = vcmask 254976   ;;  %v491_v0 = vmov 0.0   ;;  %s757_s0 = inlined_call_operand.<no memory space> [shape: s32[1], index: 0, kind: input, shape index: {}]   ;;  %s758_s1 = inlined_call_operand.vmem [shape: bf16[8,2,128], index: 1, kind: input, shape index: {}]   ;;  %s759_s2 = inlined_call_operand.vmem [shape: bf16[8,2,128], index: 2, kind: input, shape index: {}]   ;;  %s760_s3 = inlined_call_operand.vmem [shape: s32[2,1], index: 3, kind: input, shape index: {}]   ;;  %s761_s4 = inlined_call_operand.vmem [shape: f32[32,128], index: 4, kind: input, shape index: {}]   ;;  %s762_s5 = inlined_call_operand.vmem [shape: f32[32,128], index: 5, kind: input, shape index: {}]   ;;  %s763_s6 = inlined_call_operand.vmem [shape: f32[8,2,32], index: 6, kind: output, shape index: {0}]   ;;  %s764_s7 = inlined_call_operand.vmem [shape: f32[8,2,32], index: 7, kind: output, shape index: {1}]  }
   0x1   :  { %62 = vst.msk [vmem:[#allocation2] sm:$0x3] %vm61_vm0, %v491_v0  ;;  %p70_p0 = scmp.gt.s32.totalorder %s757_s0, 0 }
   0x2   :  { %63 = vst.msk [vmem:[#allocation3] sm:$0x3] %vm61_vm0, %v491_v0 }
   0x3   :  { %64 = vst.msk [vmem:[#allocation4] sm:$0x3] %vm61_vm0, %v491_v0  ;;  %p543_p1 = por %p70_p0, %p70_p0 }
   0x4   :  { %65 = vst.msk [vmem:[#allocation5] sm:$0x3] %vm61_vm0, %v491_v0  ;;  %v553_v1 = vld [vmem:[%s760_s3] sm:$0x3] (%p543_p1)  ;;  %v563_v3 = vld [vmem:[%s761_s4 + $0x8] sm:$0xff] (%p543_p1)  ;;  %v568_v4 = vld [vmem:[%s761_s4 + $0x10] sm:$0xff] (%p543_p1) }
   0x5   :  { %75 = sbr.rel (!%p543_p1) target bundleno = 677 (0x2a5), region = 29  ;;  %v558_v2 = vld [vmem:[%s761_s4] sm:$0xff] (%p543_p1)  ;;  %v573_v5 = vld [vmem:[%s761_s4 + $0x18] sm:$0xff] (%p543_p1)  ;;  %v583_v7 = vld [vmem:[%s762_s5 + $0x8] sm:$0xff] (%p543_p1)  ;;  %s603_s4 = smov (%p543_p1), 0  }
   0x6   :  { %v578_v6 = vld [vmem:[%s762_s5] sm:$0xff] (%p543_p1)  ;;  %v588_v8 = vld [vmem:[%s762_s5 + $0x10] sm:$0xff] (%p543_p1)  ;;  %v593_v9 = vld [vmem:[%s762_s5 + $0x18] sm:$0xff] (%p543_p1) }
   0x8   :  { %v85_v10 = vld [vmem:[#allocation2] sm:$0x3] (%p543_p1)  }
   0x9   :  { %v86_v11 = vld [vmem:[#allocation3] sm:$0x3] (%p543_p1)  }
   0xa   :  { %v87_v12 = vld [vmem:[#allocation4] sm:$0x3]  }
   0xb   :  { %v88_v13 = vld [vmem:[#allocation5] sm:$0x3]  }
   0xc LB: > { %121 = vmatpush.msra.mxu0 %v573_v5  ;;  %148 = vmatpush.msra.mxu1 %v593_v9  ;;  %s492_s5 = smov 32   ;;  %vm105_vm1 = vcmask 261120   ;;  %s102_s22 = scalar_lea.vmem %s758_s1, %s489_s4  ;;  %s489_s4 = sphi %s603_s4, %s94_s4   ;;  %v485_v10 = vphi %v85_v10, %v769_v10   ;;  %v481_v11 = vphi %v86_v11, %v768_v11   ;;  %v477_v12 = vphi %v87_v12, %v767_v12   ;;  %v473_v13 = vphi %v88_v13, %v766_v13  }
   0xd   : > { %178 = vrot.lane.b32.xlu1 %v481_v11, %s492_s5  ;;  %219 = vrot.lane.b32.xlu2 %v473_v13, %s492_s5  ;;  %s639_s23 = ssub.s32 7, %s489_s4  ;;  %v103_v14 = vld [vmem:[%s102_s22] sm:$0x1]  ;;  %s493_s28 = smov 64  }
   0xe   : > { %122 = vmatpush.msra.mxu0 %v568_v4  ;;  %149 = vmatpush.msra.mxu1 %v588_v8  ;;  %s130_s27 = scalar_lea.vmem %s759_s2, %s639_s23  ;;  %v104_v15 = vunpack.c.l.bf16 %v103_v14  ;;  %v241_v0 = vstv %s639_s23  ;;  %v494_v14 = vmov 0   ;;  %s495_s29 = smov 96  }
   0xf   : > { %v131_v16 = vld [vmem:[%s130_s27] sm:$0x1]  ;;  %vm242_vm10 = vcmp.gt.s32.totalorder %v553_v1, %v241_v0  ;;  %434 = vset.pattern.permute.xlu0 %v494_v14  ;;  %433 = vset.pattern.permute.xlu2 %v494_v14  ;;  %s386_s0 = sshll.u32 %s639_s23, 1  ;;  %s385_s10 = sshll.u32 %s489_s4, 1 }
  0x10   : > { %123 = vmatpush.msra.mxu0 %v563_v3  ;;  %150 = vmatpush.msra.mxu1 %v583_v7  ;;  %v132_v19 = vunpack.c.l.bf16 %v131_v16  ;;  %v239_v16 = vstv %s489_s4  ;;  %s298_s9 = scalar_lea.vmem %s764_s7, %s386_s0  ;;  %s288_s3 = scalar_lea.vmem %s763_s6, %s385_s10 }
  0x11   : > { %vm240_vm11 = vcmp.gt.s32.totalorder %v553_v1, %v239_v16  ;;  %s94_s4 = sadd.s32 1, %s489_s4  }
  0x12   : > { %124 = vmatpush.msra.mxu0 %v558_v2  ;;  %151 = vmatpush.msra.mxu1 %v578_v6  ;;  %p91_p2 = scmp.ge.s32.totalorder %s94_s4, 8  }
  0x13   : > { %381 = vmatmul.msk.f32.vlgmr.msra.gmra.mxu0 %vm105_vm1, %v485_v10  ;;  %382 = vmatmul.msk.f32.vlgmr.msra.gmra.mxu1 %vm105_vm1, %v477_v12 }
  0x67   : > { %v220_v54 = vpop.permute.xlu2 %219 }
  0x7f   : > { %v179_v58 = vpop.permute.xlu1 %178 }
  0x90   : > { %v126_v17 = vpop.f32.mrf.mxu0  ;;  %v153_v20 = vpop.f32.mrf.mxu1 }
  0x91   : > { %v129_v18 = vadd.f32 %v126_v17, %v104_v15  ;;  %v156_v21 = vadd.f32 %v153_v20, %v132_v19  ;;  %v262_v15 = vsel %vm242_vm10, 1, %v494_v14  ;;  %v243_v19 = vsel %vm240_vm11, 1, %v494_v14 }
  0x93   : > { %435 = vtanh.f32 %v129_v18  ;;  %v383_v24 = vmul.f32 -1.442695, %v129_v18  ;;  %v384_v25 = vmul.f32 -1.442695, %v156_v21 }
  0x94   : > { %437 = vtanh.f32 %v156_v21 }
  0x95   : > { %439 = vpow2.f32 %v383_v24 }
  0x96   : > { %441 = vpow2.f32 %v384_v25 }
  0x99   : > { %v436_v22 = vpop.eup %435 }
  0x9a   : > { %183 = vrot.lane.b32.xlu0 %v436_v22, %s493_s28  ;;  %v438_v23 = vpop.eup %437 }
  0x9b   : > { %v440_v26 = vpop.eup %439 }
  0x9c   : > { %v160_v27 = vadd.f32 1.0, %v440_v26  ;;  %v442_v28 = vpop.eup %441 }
  0x9d   : > { %v201_v29 = vadd.f32 1.0, %v442_v28 }
  0x9e   : > { %443 = vrcp.f32 %v160_v27  ;;  %v172_v38 = vand.u32 2147483648, %v160_v27  ;;  %vm166_vm3 = vweird.f32 %v160_v27  ;;  %v170_v39 = vand.u32 2147483647, %v160_v27 }
  0x9f   : > { %445 = vrcp.f32 %v201_v29  ;;  %vm207_vm6 = vweird.f32 %v201_v29  ;;  %v213_v44 = vand.u32 2147483648, %v201_v29  ;;  %v211_v47 = vand.u32 2147483647, %v201_v29 }
  0xa0   : > { %v173_v42 = vor.u32 1.1754944e-38, %v172_v38  ;;  %vm171_vm5 = vcmp.eq.f32.partialorder %v170_v39, 8.507059e+37 }
  0xa1   : > { %v214_v49 = vor.u32 1.1754944e-38, %v213_v44  ;;  %vm212_vm9 = vcmp.eq.f32.partialorder %v211_v47, 8.507059e+37 }
  0xa2   : > { %224 = vrot.lane.b32.xlu0 %v438_v23, %s493_s28 }
  0xa4   : > { %v444_v30 = vpop.eup %443 }
  0xa5   : > { %v162_v31 = vmul.f32 %v444_v30, %v160_v27  ;;  %v446_v33 = vpop.eup %445  ;;  %vm167_vm2 = vweird.f32 %v444_v30 }
  0xa6   : > { %v203_v35 = vmul.f32 %v446_v33, %v201_v29  ;;  %vm168_vm4 = vmor %vm166_vm3, %vm167_vm2  ;;  %vm208_vm7 = vweird.f32 %v446_v33 }
  0xa7   : > { %v163_v32 = vsub.f32 1.0, %v162_v31  ;;  %vm209_vm8 = vmor %vm207_vm6, %vm208_vm7 }
  0xa8   : > { %v204_v37 = vsub.f32 1.0, %v203_v35 }
  0xa9   : > { %v164_v34 = vmul.f32 %v444_v30, %v163_v32 }
  0xaa   : > { %v205_v41 = vmul.f32 %v446_v33, %v204_v37 }
  0xab   : > { %v165_v36 = vadd.f32 %v444_v30, %v164_v34 }
  0xac   : > { %v206_v46 = vadd.f32 %v446_v33, %v205_v41 }
  0xad   : > { %v169_v40 = vsel %vm168_vm4, %v444_v30, %v165_v36 }
  0xae   : > { %v174_v43 = vsel %vm171_vm5, %v173_v42, %v169_v40  ;;  %v210_v50 = vsel %vm209_vm8, %v446_v33, %v206_v46 }
  0xaf   : > { %v215_v51 = vsel %vm212_vm9, %v214_v49, %v210_v50  ;;  %v181_v60 = vmul.f32 %v179_v58, %v174_v43 }
  0xb0   : > { %v222_v55 = vmul.f32 %v220_v54, %v215_v51 }
 0x10c   : > { %v184_v45 = vpop.permute.xlu0 %183 }
 0x10d   : > { %v186_v48 = vmul.f32 %v184_v45, %v174_v43 }
 0x10f   : > { %188 = vrot.lane.b32.xlu1 %v186_v48, %s492_s5 }
 0x114   : > { %v225_v52 = vpop.permute.xlu0 %224 }
 0x115   : > { %v227_v53 = vmul.f32 %v225_v52, %v215_v51 }
 0x117   : > { %229 = vrot.lane.b32.xlu2 %v227_v53, %s492_s5 }
 0x11f   : > { %245 = vperm.xlu2 %433, %v243_v19  }
 0x171   : > { %v230_v56 = vpop.permute.xlu2 %229 }
 0x172   : > { %v232_v57 = vadd.f32 %v230_v56, %v222_v55 }
 0x174   : > { %447 = vtanh.f32 %v232_v57 }
 0x179   : > { %v246_v28 = vpop.permute.xlu2 %245 }
 0x17a   : > { %v448_v59 = vpop.eup %447  ;;  %vm247_vm12 = vcmp.eq.s32.totalorder %v246_v28, 1 }
 0x17b   : > { %235 = vrot.lane.b32.xlu1 %v448_v59, %s493_s28 }
 0x181   : > { %v189_v61 = vpop.permute.xlu1 %188 }
 0x182   : > { %v191_v62 = vadd.f32 %v189_v61, %v181_v60 }
 0x184   : > { %449 = vtanh.f32 %v191_v62 }
 0x18a   : > { %v450_v63 = vpop.eup %449 }
 0x18b   : > { %194 = vrot.lane.b32.xlu0 %v450_v63, %s493_s28 }
 0x193   : > { %264 = vperm.xlu0 %434, %v262_v15  }
 0x1ed   : > { %v236_v21 = vpop.permute.xlu1 %235 }
 0x1ee   : > { %v238_v22 = vmul.f32 %v236_v21, %v215_v51 }
 0x1fd   : > { %v195_v17 = vpop.permute.xlu0 %194 }
 0x1fe   : > { %v197_v18 = vmul.f32 %v195_v17, %v174_v43 }
 0x200   : > { %249 = vst [vmem:[#allocation1] ss:$4 sm:$0xff] %v197_v18 }
 0x205   : > { %v265_v31 = vpop.permute.xlu0 %264 }
 0x206   : > { %vm266_vm13 = vcmp.eq.s32.totalorder %v265_v31, 1 }
 0x207   : > { %v250_v20 = vld.sshfl [vmem:[#allocation1] sm:$0xff pattern:$0x73625140] }
 0x208   : > { %256 = vst [vmem:[#allocation1] ss:$4 sm:$0xff] %v191_v62  ;;  %251 = vrot.lane.b32.xlu1 %v250_v20, %s492_s5 }
 0x20f   : > { %v257_v23 = vld.sshfl [vmem:[#allocation1] sm:$0xff pattern:$0x73625140] }
 0x210   : > { %268 = vst [vmem:[#allocation1] ss:$4 sm:$0xff] %v238_v22 }
 0x217   : > { %v269_v24 = vld.sshfl [vmem:[#allocation1] sm:$0xff pattern:$0x73625140] }
 0x218   : > { %270 = vrot.lane.b32.xlu0 %v269_v24, %s492_s5  ;;  %275 = vst [vmem:[#allocation1] ss:$4 sm:$0xff] %v232_v57 }
 0x21f   : > { %v276_v25 = vld.sshfl [vmem:[#allocation1] sm:$0xff pattern:$0x73625140] }
 0x220   : > { %281 = vst [vmem:[#allocation1] ss:$4 sm:$0xff] %v197_v18 }
 0x227   : > { %v282_v26 = vld.sshfl [vmem:[#allocation1] sm:$0xff pattern:$0x73625140] }
 0x228   : > { %283 = vrot.lane.b32.xlu1 %v282_v26, %s492_s5  ;;  %291 = vst [vmem:[#allocation1] ss:$4 sm:$0xff] %v238_v22 }
 0x22f   : > { %v292_v27 = vld.sshfl [vmem:[#allocation1] sm:$0xff pattern:$0x73625140] }
 0x230   : > { %277 = vrot.lane.b32.xlu1 %v276_v25, %s495_s29  ;;  %293 = vrot.lane.b32.xlu2 %v292_v27, %s492_s5 }
 0x238   : > { %258 = vrot.lane.b32.xlu2 %v257_v23, %s495_s29 }
 0x27a   : > { %v252_v29 = vpop.permute.xlu1 %251 }
 0x27b   : > { %v254_v30 = vsel %vm247_vm12, %v252_v29, %v485_v10  }
 0x27c   :  { %301 = vst.msk [vmem:[#allocation2] sm:$0x3] (%p91_p2), %vm61_vm0, %v254_v30 }
 0x28a   : > { %v271_v32 = vpop.permute.xlu0 %270  ;;  %v294_v33 = vpop.permute.xlu2 %293 }
 0x28b   : > { %v273_v34 = vsel %vm266_vm13, %v271_v32, %v477_v12   ;;  %v296_v35 = vsel %vm266_vm13, %v294_v33, 0.0 }
 0x28c   : > { %299 = vst.msk [vmem:[%s298_s9] sm:$0x3] %vm61_vm0, %v296_v35  ;;  %v767_v12 = vmov %v273_v34 }
 0x28d   :  { %303 = vst.msk [vmem:[#allocation4] sm:$0x3] (%p91_p2), %vm61_vm0, %v273_v34 }
 0x292   : > { %v259_v36 = vpop.permute.xlu2 %258 }
 0x293   : > { %v261_v37 = vsel %vm247_vm12, %v259_v36, %v481_v11  }
 0x294   : > { %v768_v11 = vmov %v261_v37  ;;  %302 = vst.msk [vmem:[#allocation3] sm:$0x3] (%p91_p2), %vm61_vm0, %v261_v37 }
 0x29a   : > { %v284_v10 = vpop.permute.xlu1 %283 }
 0x29b   : > { %v286_v38 = vsel %vm247_vm12, %v284_v10, 0.0  ;;  %v769_v10 = vmov %v254_v30 }
 0x29c   : > { %290 = vst.msk [vmem:[%s288_s3] sm:$0x3] %vm61_vm0, %v286_v38 }
 0x2a0   :  { %93 = sbr.rel (!%p91_p2) target bundleno = 12 (0xc), region = 78 }
 0x2a2   : > { %v278_v39 = vpop.permute.xlu1 %277 }
 0x2a3   : > { %v280_v40 = vsel %vm266_vm13, %v278_v39, %v473_v13  }
 0x2a4   : > { %v766_v13 = vmov %v280_v40  ;;  %304 = vst.msk [vmem:[#allocation5] sm:$0x3] (%p91_p2), %vm61_vm0, %v280_v40 }
 0x2a5 PF:  { %307 = sbr.rel (%p543_p1) target bundleno = 699 (0x2bb), region = 40 }
 0x2aa   :  { %v496_v41 = vmov 0.0  }
 0x2ab   :  { %309 = vst.msk [vmem:[%s763_s6] sm:$0x3] %vm61_vm0, %v496_v41 }
 0x2ac   :  { %310 = vst.msk [vmem:[%s763_s6 + $0x2] sm:$0x3] %vm61_vm0, %v496_v41 }
 0x2ad   :  { %311 = vst.msk [vmem:[%s763_s6 + $0x4] sm:$0x3] %vm61_vm0, %v496_v41 }
 0x2ae   :  { %312 = vst.msk [vmem:[%s763_s6 + $0x6] sm:$0x3] %vm61_vm0, %v496_v41 }
 0x2af   :  { %313 = vst.msk [vmem:[%s763_s6 + $0x8] sm:$0x3] %vm61_vm0, %v496_v41 }
 0x2b0   :  { %314 = vst.msk [vmem:[%s763_s6 + $0xa] sm:$0x3] %vm61_vm0, %v496_v41 }
 0x2b1   :  { %315 = vst.msk [vmem:[%s763_s6 + $0xc] sm:$0x3] %vm61_vm0, %v496_v41 }
 0x2b2   :  { %316 = vst.msk [vmem:[%s763_s6 + $0xe] sm:$0x3] %vm61_vm0, %v496_v41 }
 0x2b3   :  { %317 = vst.msk [vmem:[%s764_s7] sm:$0x3] %vm61_vm0, %v496_v41 }
 0x2b4   :  { %318 = vst.msk [vmem:[%s764_s7 + $0x2] sm:$0x3] %vm61_vm0, %v496_v41 }
 0x2b5   :  { %319 = vst.msk [vmem:[%s764_s7 + $0x4] sm:$0x3] %vm61_vm0, %v496_v41 }
 0x2b6   :  { %320 = vst.msk [vmem:[%s764_s7 + $0x6] sm:$0x3] %vm61_vm0, %v496_v41 }
 0x2b7   :  { %321 = vst.msk [vmem:[%s764_s7 + $0x8] sm:$0x3] %vm61_vm0, %v496_v41 }
 0x2b8   :  { %322 = vst.msk [vmem:[%s764_s7 + $0xa] sm:$0x3] %vm61_vm0, %v496_v41 }
 0x2b9   :  { %323 = vst.msk [vmem:[%s764_s7 + $0xc] sm:$0x3] %vm61_vm0, %v496_v41 }
 0x2ba   :  { %324 = vst.msk [vmem:[%s764_s7 + $0xe] sm:$0x3] %vm61_vm0, %v496_v41 }
 0x2bb PF:  {}

// kernel: ram_forward.5
= control target key start
LH: loop header
LB: loop body
LE: loop exit
PB: predicated region body
PF: predicated region fallthrough
CT: control target
= control target key end

     0   :  { %vm88_vm0 = vcmask 523264   ;;  %vm116_vm1 = vcmask 517120   ;;  %vm122_vm2 = vcmask 58368   ;;  %v148_v25 = vlaneseq  ;;  %s1282_s3 = inlined_call_operand.vmem [shape: f32[64,64], index: 3, kind: input, shape index: {}]   ;;  %s1283_s4 = inlined_call_operand.vmem [shape: f32[1,64], index: 4, kind: input, shape index: {}]   ;;  %s1284_s2 = inlined_call_operand.vmem [shape: f32[2,64], index: 2, kind: input, shape index: {}]   ;;  %s1285_s5 = inlined_call_operand.vmem [shape: f32[1,64], index: 5, kind: input, shape index: {}]   ;;  %s1286_s1 = inlined_call_operand.vmem [shape: f32[2,8], index: 1, kind: input, shape index: {}]   ;;  %s1287_s8 = inlined_call_operand.vmem [shape: f32[64,192], index: 8, kind: input, shape index: {}]   ;;  %s1288_s6 = inlined_call_operand.vmem [shape: f32[64,192], index: 6, kind: input, shape index: {}]   ;;  %s1289_s0 = inlined_call_operand.vmem [shape: bf16[2,8,64], index: 0, kind: input, shape index: {}]   ;;  %s1290_s9 = inlined_call_operand.vmem [shape: f32[1,192], index: 9, kind: input, shape index: {}]   ;;  %s1291_s7 = inlined_call_operand.vmem [shape: f32[1,192], index: 7, kind: input, shape index: {}]   ;;  %s1292_s10 = inlined_call_operand.vmem [shape: f32[2,64], index: 10, kind: output, shape index: {}]  }
   0x1   :  { %v841_v0 = vld [vmem:[%s1282_s3 + $0x38] sm:$0xff]  ;;  %v846_v1 = vld [vmem:[%s1282_s3 + $0x30] sm:$0xff]  ;;  %v852_v2 = vld [vmem:[%s1282_s3 + $0x28] sm:$0xff]  ;;  %vm184_vm7 = vcmask 1041409  }
   0x2   :  { %100 = vmatpush.msra.mxu0 %v841_v0  ;;  %v858_v3 = vld [vmem:[%s1282_s3 + $0x20] sm:$0xff]  ;;  %v864_v4 = vld [vmem:[%s1282_s3 + $0x18] sm:$0xff]  ;;  %v870_v5 = vld [vmem:[%s1282_s3 + $0x10] sm:$0xff]  ;;  %v149_v26 = vshrl.u32 %v148_v25, 7 }
   0x3   :  { %v876_v6 = vld [vmem:[%s1282_s3 + $0x8] sm:$0xff]  ;;  %v882_v7 = vld [vmem:[%s1282_s3] sm:$0xff]  ;;  %v919_v41 = vld [vmem:[%s1287_s8 + $0x70] sm:$0xff] }
   0x4   :  { %101 = vmatpush.msra.mxu0 %v846_v1  ;;  %v888_v8 = vld [vmem:[%s1284_s2] sm:$0x3]  ;;  %742 = vset.pattern.permute.xlu2 %v149_v26  ;;  %v930_v43 = vld [vmem:[%s1287_s8 + $0x50] sm:$0xff]  ;;  %v942_v45 = vld [vmem:[%s1288_s6 + $0x78] sm:$0xff] }
   0x5   :  { %v896_v9 = vld [vmem:[%s1283_s4] ss:$0 sm:$0xff]  ;;  %741 = vset.pattern.permute.xlu1 %v149_v26  ;;  %743 = vset.pattern.permute.xlu0 %v149_v26  ;;  %v937_v44 = vld [vmem:[%s1288_s6 + $0x70] sm:$0xff]  ;;  %v960_v48 = vld [vmem:[%s1288_s6 + $0x68] sm:$0xff] }
   0x6   :  { %102 = vmatpush.msra.mxu0 %v852_v2  ;;  %v901_v10 = vld [vmem:[%s1285_s5] ss:$0 sm:$0xff]  ;;  %241 = vmatpush.msra.mxu3 %v919_v41  ;;  %v965_v49 = vld [vmem:[%s1287_s8 + $0x30] sm:$0xff]  ;;  %v978_v51 = vld [vmem:[%s1288_s6 + $0x58] sm:$0xff] }
   0x7   :  { %v909_v15 = vld [vmem:[%s1286_s1] sm:$0x3]  ;;  %s782_s1 = smov 64   ;;  %196 = vmatpush.msra.mxu1 %v937_v44  ;;  %216 = vmatpush.msra.mxu2 %v942_v45  ;;  %v973_v50 = vld [vmem:[%s1288_s6 + $0x50] sm:$0xff]  ;;  %v996_v54 = vld [vmem:[%s1288_s6 + $0x48] sm:$0xff] }
   0x8   :  { %103 = vmatpush.msra.mxu0 %v858_v3  ;;  %v924_v42 = vld [vmem:[%s1287_s8 + $0x60] sm:$0xff]  ;;  %v1001_v55 = vld [vmem:[%s1287_s8 + $0x10] sm:$0xff]  ;;  %v1014_v57 = vld [vmem:[%s1288_s6 + $0x38] sm:$0xff] }
   0x9   :  { %242 = vmatpush.msra.mxu3 %v924_v42  ;;  %v947_v46 = vld [vmem:[%s1287_s8 + $0x40] sm:$0xff]  ;;  %217 = vmatpush.msra.mxu2 %v960_v48  ;;  %v1009_v56 = vld [vmem:[%s1288_s6 + $0x30] sm:$0xff]  ;;  %v1032_v60 = vld [vmem:[%s1288_s6 + $0x28] sm:$0xff] }
   0xa   :  { %104 = vmatpush.msra.mxu0 %v864_v4  ;;  %v955_v47 = vld [vmem:[%s1288_s6 + $0x60] sm:$0xff]  ;;  %v1043_v62 = vld [vmem:[%s1288_s6 + $0x10] sm:$0xff]  ;;  %v1048_v63 = vld [vmem:[%s1288_s6 + $0x18] sm:$0xff] }
   0xb   :  { %243 = vmatpush.msra.mxu3 %v930_v43  ;;  %197 = vmatpush.msra.mxu1 %v955_v47  ;;  %v983_v52 = vld [vmem:[%s1287_s8 + $0x20] sm:$0xff]  ;;  %v1123_v25 = vld [vmem:[%s1287_s8 + $0x18] sm:$0xff] }
   0xc   :  { %105 = vmatpush.msra.mxu0 %v870_v5  ;;  %218 = vmatpush.msra.mxu2 %v978_v51  ;;  %v991_v53 = vld [vmem:[%s1288_s6 + $0x40] sm:$0xff] }
   0xd   :  { %244 = vmatpush.msra.mxu3 %v947_v46  ;;  %198 = vmatpush.msra.mxu1 %v973_v50  ;;  %v1019_v58 = vld [vmem:[%s1287_s8] sm:$0xff] }
   0xe   :  { %106 = vmatpush.msra.mxu0 %v876_v6  ;;  %219 = vmatpush.msra.mxu2 %v996_v54  ;;  %v1027_v59 = vld [vmem:[%s1288_s6 + $0x20] sm:$0xff] }
   0xf   :  { %245 = vmatpush.msra.mxu3 %v965_v49  ;;  %199 = vmatpush.msra.mxu1 %v991_v53  ;;  %v737_v61 = vld [vmem:[%s1289_s0] sm:$0xff]  }
  0x10   :  { %107 = vmatpush.msra.mxu0 %v882_v7  ;;  %220 = vmatpush.msra.mxu2 %v1014_v57  ;;  %v1129_v26 = vunpack.c.l.bf16 %v737_v61 }
  0x11   :  { %718 = vmatmul.msk.f32.vlgmr.msra.gmra.mxu0 %vm88_vm0, %v888_v8  ;;  %246 = vmatpush.msra.mxu3 %v983_v52 }
  0x12   :  { %200 = vmatpush.msra.mxu1 %v1009_v56  ;;  %221 = vmatpush.msra.mxu2 %v1032_v60 }
  0x13   :  { %247 = vmatpush.msra.mxu3 %v1001_v55 }
  0x14   :  { %201 = vmatpush.msra.mxu1 %v1027_v59  ;;  %222 = vmatpush.msra.mxu2 %v1048_v63 }
  0x15   :  { %248 = vmatpush.msra.mxu3 %v1019_v58 }
  0x16   :  { %721 = vmatmul.msk.f32.vlgmr.msra.gmra.mxu3 %vm88_vm0, %v888_v8  ;;  %202 = vmatpush.msra.mxu1 %v1043_v62 }
  0x17   :  { %425 = vmatpush.msrb.mxu3 %v942_v45 }
  0x19   :  { %426 = vmatpush.msrb.mxu3 %v960_v48 }
  0x1b   :  { %427 = vmatpush.msrb.mxu3 %v978_v51 }
  0x1d   :  { %428 = vmatpush.msrb.mxu3 %v996_v54 }
  0x1f   :  { %429 = vmatpush.msrb.mxu3 %v1014_v57 }
  0x21   :  { %430 = vmatpush.msrb.mxu3 %v1032_v60 }
  0x23   :  { %431 = vmatpush.msrb.mxu3 %v1048_v63 }
  0x8e   :  { %v109_v11 = vpop.f32.mrf.mxu0 }
  0x8f   :  { %v110_v12 = vadd.f32 %v896_v9, %v109_v11  ;;  %v1054_v11 = vld [vmem:[%s1288_s6] sm:$0xff] }
  0x90   :  { %203 = vmatpush.msra.mxu1 %v1054_v11 }
  0x91   :  { %v115_v13 = vmul.f32 %v901_v10, %v110_v12  ;;  %v1061_v12 = vld [vmem:[%s1288_s6 + $0x8] sm:$0xff] }
  0x92   :  { %223 = vmatpush.msra.mxu2 %v1061_v12  ;;  %320 = vmatpush.msrb.mxu1 %v841_v0 }
  0x93   :  { %v117_v14 = vsel %vm116_vm1, %v115_v13, 0.0  ;;  %v1063_v13 = vunpack.c.h.bf16 %v737_v61  ;;  %432 = vmatpush.msrb.mxu3 %v1061_v12 }
  0x94   :  { %118 = vadd.xlane.f32.xlu0 %v117_v14  ;;  %405 = vmatpush.msrb.mxu2 %v937_v44 }
  0x95   :  { %321 = vmatpush.msrb.mxu1 %v846_v1  ;;  %606 = vmatpush.msra.mxu3 %v937_v44 }
  0x96   :  { %406 = vmatpush.msrb.mxu2 %v955_v47 }
  0x97   :  { %322 = vmatpush.msrb.mxu1 %v852_v2  ;;  %607 = vmatpush.msra.mxu3 %v955_v47 }
  0x98   :  { %407 = vmatpush.msrb.mxu2 %v973_v50 }
  0x99   :  { %323 = vmatpush.msrb.mxu1 %v858_v3  ;;  %608 = vmatpush.msra.mxu3 %v973_v50 }
  0x9a   :  { %408 = vmatpush.msrb.mxu2 %v991_v53 }
  0x9b   :  { %324 = vmatpush.msrb.mxu1 %v864_v4  ;;  %609 = vmatpush.msra.mxu3 %v991_v53 }
  0x9c   :  { %409 = vmatpush.msrb.mxu2 %v1009_v56 }
  0x9d   :  { %325 = vmatpush.msrb.mxu1 %v870_v5  ;;  %610 = vmatpush.msra.mxu3 %v1009_v56 }
  0x9e   :  { %410 = vmatpush.msrb.mxu2 %v1027_v59 }
  0x9f   :  { %326 = vmatpush.msrb.mxu1 %v876_v6  ;;  %611 = vmatpush.msra.mxu3 %v1027_v59 }
  0xa0   :  { %411 = vmatpush.msrb.mxu2 %v1043_v62 }
  0xa1   :  { %327 = vmatpush.msrb.mxu1 %v882_v7  ;;  %612 = vmatpush.msra.mxu3 %v1043_v62 }
  0xa2   :  { %412 = vmatpush.msrb.mxu2 %v1054_v11 }
  0xa3   :  { %613 = vmatpush.msra.mxu3 %v1054_v11 }
 0x107   :  { %v119_v16 = vpop.xlane.xlu0 %118 }
 0x108   :  { %v120_v17 = vadd.f32 %v119_v16, %v909_v15  ;;  %v1072_v16 = vld [vmem:[%s1287_s8 + $0x78] sm:$0xff] }
 0x109   :  { %261 = vmatpush.msrb.mxu0 %v1072_v16 }
 0x10a   :  { %746 = vtanh.f32 %v120_v17  ;;  %v1077_v17 = vld [vmem:[%s1287_s8 + $0x68] sm:$0xff] }
 0x10b   :  { %262 = vmatpush.msrb.mxu0 %v1077_v17 }
 0x110   :  { %v747_v18 = vpop.eup %746 }
 0x111   :  { %v123_v19 = vsel %vm122_vm2, %v747_v18, -inf }
 0x112   :  { %124 = vmax.xlane.f32.xlu0 %v123_v19  ;;  %v1086_v19 = vld [vmem:[%s1287_s8 + $0x58] sm:$0xff] }
 0x113   :  { %263 = vmatpush.msrb.mxu0 %v1086_v19 }
 0x126   :  { %302 = vrot.lane.b32.xlu0 %v888_v8, %s782_s1 }
 0x185   :  { %v125_v20 = vpop.xlane.xlu0 %124 }
 0x186   :  { %v126_v21 = vsub.f32 %v747_v18, %v125_v20  ;;  %v1095_v20 = vld [vmem:[%s1287_s8 + $0x48] sm:$0xff] }
 0x187   :  { %264 = vmatpush.msrb.mxu0 %v1095_v20 }
 0x188   :  { %v127_v22 = vmul.f32 1.442695, %v126_v21 }
 0x18a   :  { %748 = vpow2.f32 %v127_v22  ;;  %v1105_v22 = vld [vmem:[%s1287_s8 + $0x38] sm:$0xff] }
 0x18b   :  { %265 = vmatpush.msrb.mxu0 %v1105_v22 }
 0x190   :  { %v749_v23 = vpop.eup %748 }
 0x191   :  { %v129_v24 = vsel %vm122_vm2, %v749_v23, 0.0 }
 0x192   :  { %130 = vadd.xlane.f32.xlu1 %v129_v24 }
 0x205   :  { %v131_v27 = vpop.xlane.xlu1 %130 }
 0x206   :  { %750 = vrcp.f32 %v131_v27  ;;  %v143_v31 = vand.u32 2147483648, %v131_v27  ;;  %v141_v33 = vand.u32 2147483647, %v131_v27  ;;  %vm137_vm4 = vweird.f32 %v131_v27 }
 0x208   :  { %v144_v35 = vor.u32 1.1754944e-38, %v143_v31  ;;  %vm142_vm6 = vcmp.eq.f32.partialorder %v141_v33, 8.507059e+37 }
 0x20c   :  { %v751_v28 = vpop.eup %750 }
 0x20d   :  { %v133_v29 = vmul.f32 %v751_v28, %v131_v27  ;;  %vm138_vm3 = vweird.f32 %v751_v28  ;;  %v1134_v27 = vld [vmem:[%s1287_s8 + $0x8] sm:$0xff] }
 0x20e   :  { %vm139_vm5 = vmor %vm137_vm4, %vm138_vm3 }
 0x20f   :  { %v134_v30 = vsub.f32 1.0, %v133_v29 }
 0x211   :  { %v135_v32 = vmul.f32 %v751_v28, %v134_v30 }
 0x213   :  { %v136_v34 = vadd.f32 %v751_v28, %v135_v32 }
 0x215   :  { %v140_v36 = vsel %vm139_vm5, %v751_v28, %v136_v34 }
 0x216   :  { %v145_v37 = vsel %vm142_vm6, %v144_v35, %v140_v36 }
 0x217   :  { %v146_v38 = vmul.f32 %v749_v23, %v145_v37  ;;  %v1114_v23 = vld [vmem:[%s1287_s8 + $0x28] sm:$0xff] }
 0x218   :  { %266 = vmatpush.msrb.mxu0 %v1114_v23 }
 0x219   :  { %v154_v39 = vperm.slane %v146_v38, 1  ;;  %v147_v40 = vperm.slane %v146_v38, 0 }
 0x21a   :  { %267 = vmatpush.msrb.mxu0 %v1123_v25 }
 0x21b   :  { %159 = vperm.xlu2 %742, %v154_v39   ;;  %152 = vperm.xlu1 %741, %v147_v40  }
 0x21c   :  { %268 = vmatpush.msrb.mxu0 %v1134_v27 }
 0x21d   :  { %722 = vmatmul.msk.f32.vlgmr.msrb.gmra.mxu0 %vm88_vm0, %v888_v8 }
 0x21e   :  { %445 = vmatpush.msra.mxu0 %v919_v41 }
 0x220   :  { %446 = vmatpush.msra.mxu0 %v924_v42 }
 0x222   :  { %447 = vmatpush.msra.mxu0 %v930_v43 }
 0x224   :  { %448 = vmatpush.msra.mxu0 %v947_v46 }
 0x226   :  { %449 = vmatpush.msra.mxu0 %v965_v49 }
 0x228   :  { %450 = vmatpush.msra.mxu0 %v983_v52 }
 0x22a   :  { %451 = vmatpush.msra.mxu0 %v1001_v55 }
 0x22c   :  { %452 = vmatpush.msra.mxu0 %v1019_v58 }
 0x22e   :  { %626 = vmatpush.msrb.mxu0 %v942_v45 }
 0x230   :  { %627 = vmatpush.msrb.mxu0 %v960_v48 }
 0x232   :  { %628 = vmatpush.msrb.mxu0 %v978_v51 }
 0x234   :  { %629 = vmatpush.msrb.mxu0 %v996_v54 }
 0x236   :  { %630 = vmatpush.msrb.mxu0 %v1014_v57 }
 0x238   :  { %631 = vmatpush.msrb.mxu0 %v1032_v60 }
 0x23a   :  { %632 = vmatpush.msrb.mxu0 %v1048_v63 }
 0x23c   :  { %633 = vmatpush.msrb.mxu0 %v1061_v12 }
 0x275   :  { %v160_v14 = vpop.permute.xlu2 %159 }
 0x276   :  { %v162_v18 = vmul.f32 %v1063_v13, %v160_v14 }
 0x278   :  { %v170_v21 = vsel %vm88_vm0, %v162_v18, 0.0 }
 0x279   :  { %v171_v24 = vrot.slane %v170_v21, 4 }
 0x27b   :  { %v172_v28 = vadd.f32 %v171_v24, %v170_v21 }
 0x27d   :  { %v173_v31 = vrot.slane %v172_v28, 2 }
 0x27f   :  { %v174_v34 = vadd.f32 %v173_v31, %v172_v28  ;;  %v303_v31 = vpop.permute.xlu0 %302 }
 0x281   :  { %v175_v36 = vrot.slane %v174_v34, 1 }
 0x283   :  { %v176_v40 = vadd.f32 %v175_v36, %v174_v34 }
 0x28d   :  { %v153_v29 = vpop.permute.xlu1 %152 }
 0x28e   :  { %v161_v30 = vmul.f32 %v1129_v26, %v153_v29 }
 0x290   :  { %v163_v32 = vsel %vm88_vm0, %v161_v30, 0.0 }
 0x291   :  { %v164_v33 = vrot.slane %v163_v32, 4 }
 0x293   :  { %v165_v35 = vadd.f32 %v164_v33, %v163_v32 }
 0x295   :  { %v166_v8 = vrot.slane %v165_v35, 2 }
 0x297   :  { %v167_v37 = vadd.f32 %v166_v8, %v165_v35 }
 0x299   :  { %v168_v38 = vrot.slane %v167_v37, 1 }
 0x29a   :  { %v270_v57 = vpop.f32.mrf.mxu0 }
 0x29b   :  { %v169_v39 = vadd.f32 %v168_v38, %v167_v37 }
 0x29d   :  { %v185_v44 = vsel %vm184_vm7, %v176_v40, %v169_v39 }
 0x29e   :  { %719 = vmatmul.msk.f32.vlgmr.msra.gmra.mxu1 %vm88_vm0, %v185_v44  ;;  %720 = vmatmul.msk.f32.vlgmr.msra.gmra.mxu2 %vm88_vm0, %v185_v44 }
 0x29f   :  { %465 = vmatpush.msra.mxu1 %v1072_v16  ;;  %521 = vmatpush.msra.mxu2 %v841_v0  ;;  %v84_v0 = vld [vmem:[%s1290_s9] sm:$0x3] }
 0x2a0   :  { %v1202_v54 = vperm.slane %v84_v0, 1 }
 0x2a1   :  { %466 = vmatpush.msra.mxu1 %v1077_v17  ;;  %522 = vmatpush.msra.mxu2 %v846_v1  ;;  %v67_v1 = vld [vmem:[%s1291_s7] sm:$0x3] }
 0x2a2   :  { %v1204_v62 = vperm.slane %v67_v1, 1  ;;  %v271_v63 = vadd.f32 %v270_v57, %v1202_v54 }
 0x2a3   :  { %467 = vmatpush.msra.mxu1 %v1086_v19  ;;  %523 = vmatpush.msra.mxu2 %v852_v2  ;;  %v1196_v2 = vperm.slane %v84_v0, 0 }
 0x2a5   :  { %468 = vmatpush.msra.mxu1 %v1095_v20  ;;  %524 = vmatpush.msra.mxu2 %v858_v3  ;;  %v250_v3 = vpop.f32.mrf.mxu3 }
 0x2a7   :  { %469 = vmatpush.msra.mxu1 %v1105_v22  ;;  %525 = vmatpush.msra.mxu2 %v864_v4  ;;  %v1198_v4 = vperm.slane %v67_v1, 0 }
 0x2a9   :  { %470 = vmatpush.msra.mxu1 %v1114_v23  ;;  %526 = vmatpush.msra.mxu2 %v870_v5  ;;  %v251_v5 = vadd.f32 %v250_v3, %v1196_v2 }
 0x2ab   :  { %471 = vmatpush.msra.mxu1 %v1123_v25  ;;  %527 = vmatpush.msra.mxu2 %v876_v6 }
 0x2ad   :  { %472 = vmatpush.msra.mxu1 %v1134_v27  ;;  %528 = vmatpush.msra.mxu2 %v882_v7 }
 0x31b   :  { %v205_v6 = vpop.f32.mrf.mxu1 }
 0x31c   :  { %v206_v7 = vadd.f32 %v205_v6, %v1198_v4 }
 0x31e   :  { %v273_v45 = vadd.f32 %v251_v5, %v206_v7 }
 0x320   :  { %v723_v47 = vmul.f32 -1.442695, %v273_v45 }
 0x321   :  { %v225_v12 = vpop.f32.mrf.mxu2 }
 0x322   :  { %752 = vpow2.f32 %v723_v47  ;;  %v226_v24 = vadd.f32 %v225_v12, %v1204_v62 }
 0x328   :  { %v753_v48 = vpop.eup %752 }
 0x329   :  { %v277_v50 = vadd.f32 1.0, %v753_v48 }
 0x32b   :  { %754 = vrcp.f32 %v277_v50  ;;  %v289_v59 = vand.u32 2147483648, %v277_v50  ;;  %v287_v61 = vand.u32 2147483647, %v277_v50  ;;  %vm283_vm9 = vweird.f32 %v277_v50 }
 0x32d   :  { %v290_v14 = vor.u32 1.1754944e-38, %v289_v59  ;;  %vm288_vm11 = vcmp.eq.f32.partialorder %v287_v61, 8.507059e+37 }
 0x331   :  { %v755_v51 = vpop.eup %754 }
 0x332   :  { %v279_v53 = vmul.f32 %v755_v51, %v277_v50  ;;  %vm284_vm8 = vweird.f32 %v755_v51 }
 0x333   :  { %vm285_vm10 = vmor %vm283_vm9, %vm284_vm8 }
 0x334   :  { %v280_v56 = vsub.f32 1.0, %v279_v53 }
 0x336   :  { %v281_v60 = vmul.f32 %v755_v51, %v280_v56 }
 0x338   :  { %v282_v11 = vadd.f32 %v755_v51, %v281_v60 }
 0x33a   :  { %v286_v18 = vsel %vm285_vm10, %v755_v51, %v282_v11 }
 0x33b   :  { %v291_v21 = vsel %vm288_vm11, %v290_v14, %v286_v18 }
 0x33c   :  { %v293_v28 = vmul.f32 %v291_v21, %v271_v63  ;;  %v296_v32 = vsub.f32 1.0, %v291_v21  ;;  %v305_v34 = vmul.f32 %v303_v31, %v291_v21 }
 0x33e   :  { %v294_v29 = vadd.f32 %v293_v28, %v226_v24 }
 0x340   :  { %756 = vtanh.f32 %v294_v29 }
 0x346   :  { %v757_v30 = vpop.eup %756 }
 0x347   :  { %298 = vrot.lane.b32.xlu2 %v757_v30, %s782_s1 }
 0x3a1   :  { %v299_v33 = vpop.permute.xlu2 %298 }
 0x3a2   :  { %v301_v35 = vmul.f32 %v299_v33, %v296_v32 }
 0x3a4   :  { %v1209_v8 = vadd.f32 %v305_v34, %v301_v35 }
 0x3a6   :  { %308 = vrot.lane.b32.xlu2 %v1209_v8, %s782_s1 }
 0x400   :  { %v309_v36 = vpop.permute.xlu2 %308 }
 0x401   :  { %724 = vmatmul.msk.f32.vlgmr.msrb.gmra.mxu1 %vm88_vm0, %v309_v36  ;;  %727 = vmatmul.msk.f32.vlgmr.msra.gmra.mxu0 %vm88_vm0, %v309_v36 }
 0x402   :  { %646 = vmatpush.msrb.mxu1 %v919_v41 }
 0x404   :  { %647 = vmatpush.msrb.mxu1 %v924_v42 }
 0x406   :  { %648 = vmatpush.msrb.mxu1 %v930_v43 }
 0x408   :  { %649 = vmatpush.msrb.mxu1 %v947_v46 }
 0x409   :  { %728 = vmatmul.msk.f32.vlgmr.msra.gmra.mxu1 %vm88_vm0, %v309_v36 }
 0x40a   :  { %650 = vmatpush.msrb.mxu1 %v965_v49 }
 0x40c   :  { %651 = vmatpush.msrb.mxu1 %v983_v52 }
 0x40e   :  { %652 = vmatpush.msrb.mxu1 %v1001_v55 }
 0x410   :  { %653 = vmatpush.msrb.mxu1 %v1019_v58 }
 0x47e   :  { %v329_v37 = vpop.f32.mrf.mxu1 }
 0x47f   :  { %v330_v38 = vadd.f32 %v896_v9, %v329_v37  ;;  %v454_v37 = vpop.f32.mrf.mxu0 }
 0x481   :  { %v332_v41 = vmul.f32 %v901_v10, %v330_v38 }
 0x483   :  { %v333_v42 = vsel %vm116_vm1, %v332_v41, 0.0  ;;  %v455_v41 = vadd.f32 %v454_v37, %v1196_v2 }
 0x484   :  { %334 = vadd.xlane.f32.xlu2 %v333_v42 }
 0x4f7   :  { %v335_v43 = vpop.xlane.xlu2 %334 }
 0x4f8   :  { %v336_v46 = vadd.f32 %v335_v43, %v909_v15 }
 0x4fa   :  { %758 = vtanh.f32 %v336_v46 }
 0x500   :  { %v759_v39 = vpop.eup %758 }
 0x501   :  { %v338_v49 = vsel %vm122_vm2, %v759_v39, -inf }
 0x502   :  { %339 = vmax.xlane.f32.xlu1 %v338_v49 }
 0x575   :  { %v340_v52 = vpop.xlane.xlu1 %339 }
 0x576   :  { %v341_v55 = vsub.f32 %v759_v39, %v340_v52 }
 0x578   :  { %v342_v40 = vmul.f32 1.442695, %v341_v55 }
 0x57a   :  { %760 = vpow2.f32 %v342_v40 }
 0x580   :  { %v761_v58 = vpop.eup %760 }
 0x581   :  { %v344_v44 = vsel %vm122_vm2, %v761_v58, 0.0 }
 0x582   :  { %345 = vadd.xlane.f32.xlu0 %v344_v44 }
 0x5f5   :  { %v346_v0 = vpop.xlane.xlu0 %345 }
 0x5f6   :  { %762 = vrcp.f32 %v346_v0  ;;  %v358_v6 = vand.u32 2147483648, %v346_v0  ;;  %v356_v45 = vand.u32 2147483647, %v346_v0  ;;  %vm352_vm13 = vweird.f32 %v346_v0 }
 0x5f8   :  { %v359_v48 = vor.u32 1.1754944e-38, %v358_v6  ;;  %vm357_vm15 = vcmp.eq.f32.partialorder %v356_v45, 8.507059e+37 }
 0x5fc   :  { %v763_v1 = vpop.eup %762 }
 0x5fd   :  { %v348_v3 = vmul.f32 %v763_v1, %v346_v0  ;;  %vm353_vm12 = vweird.f32 %v763_v1 }
 0x5fe   :  { %vm354_vm14 = vmor %vm352_vm13, %vm353_vm12 }
 0x5ff   :  { %v349_v5 = vsub.f32 1.0, %v348_v3 }
 0x601   :  { %v350_v7 = vmul.f32 %v763_v1, %v349_v5 }
 0x603   :  { %v351_v47 = vadd.f32 %v763_v1, %v350_v7 }
 0x605   :  { %v355_v50 = vsel %vm354_vm14, %v763_v1, %v351_v47 }
 0x606   :  { %v360_v51 = vsel %vm357_vm15, %v359_v48, %v355_v50 }
 0x607   :  { %v361_v53 = vmul.f32 %v761_v58, %v360_v51 }
 0x609   :  { %v369_v56 = vperm.slane %v361_v53, 1  ;;  %v362_v57 = vperm.slane %v361_v53, 0 }
 0x60b   :  { %374 = vperm.xlu1 %741, %v369_v56   ;;  %367 = vperm.xlu2 %742, %v362_v57  }
 0x665   :  { %v368_v59 = vpop.permute.xlu2 %367 }
 0x666   :  { %v376_v60 = vmul.f32 %v1129_v26, %v368_v59 }
 0x668   :  { %v378_v61 = vsel %vm88_vm0, %v376_v60, 0.0 }
 0x669   :  { %v379_v63 = vrot.slane %v378_v61, 4 }
 0x66b   :  { %v380_v11 = vadd.f32 %v379_v63, %v378_v61 }
 0x66d   :  { %v381_v18 = vrot.slane %v380_v11, 2 }
 0x66f   :  { %v382_v28 = vadd.f32 %v381_v18, %v380_v11 }
 0x671   :  { %v383_v31 = vrot.slane %v382_v28, 1 }
 0x673   :  { %v384_v34 = vadd.f32 %v383_v31, %v382_v28 }
 0x67d   :  { %v375_v12 = vpop.permute.xlu1 %374 }
 0x67e   :  { %v377_v14 = vmul.f32 %v1063_v13, %v375_v12 }
 0x680   :  { %v385_v21 = vsel %vm88_vm0, %v377_v14, 0.0 }
 0x681   :  { %v386_v24 = vrot.slane %v385_v21, 4 }
 0x683   :  { %v387_v29 = vadd.f32 %v386_v24, %v385_v21 }
 0x685   :  { %v388_v30 = vrot.slane %v387_v29, 2 }
 0x687   :  { %v389_v32 = vadd.f32 %v388_v30, %v387_v29 }
 0x689   :  { %v390_v33 = vrot.slane %v389_v32, 1 }
 0x68b   :  { %v391_v35 = vadd.f32 %v390_v33, %v389_v32 }
 0x68d   :  { %v394_v36 = vsel %vm184_vm7, %v391_v35, %v384_v34 }
 0x68e   :  { %725 = vmatmul.msk.f32.vlgmr.msrb.gmra.mxu2 %vm88_vm0, %v394_v36  ;;  %726 = vmatmul.msk.f32.vlgmr.msrb.gmra.mxu3 %vm88_vm0, %v394_v36 }
 0x68f   :  { %666 = vmatpush.msrb.mxu2 %v1072_v16 }
 0x691   :  { %667 = vmatpush.msrb.mxu2 %v1077_v17 }
 0x693   :  { %668 = vmatpush.msrb.mxu2 %v1086_v19 }
 0x695   :  { %669 = vmatpush.msrb.mxu2 %v1095_v20 }
 0x697   :  { %670 = vmatpush.msrb.mxu2 %v1105_v22 }
 0x699   :  { %671 = vmatpush.msrb.mxu2 %v1114_v23 }
 0x69b   :  { %672 = vmatpush.msrb.mxu2 %v1123_v25 }
 0x69d   :  { %673 = vmatpush.msrb.mxu2 %v1134_v27  ;;  %v474_v27 = vpop.f32.mrf.mxu1 }
 0x69e   :  { %v475_v40 = vadd.f32 %v474_v27, %v1202_v54 }
 0x711   :  { %v414_v38 = vpop.f32.mrf.mxu2  ;;  %v434_v52 = vpop.f32.mrf.mxu3 }
 0x712   :  { %v415_v16 = vadd.f32 %v414_v38, %v1198_v4  ;;  %v435_v0 = vadd.f32 %v434_v52, %v1204_v62 }
 0x714   :  { %v477_v42 = vadd.f32 %v455_v41, %v415_v16 }
 0x716   :  { %v729_v17 = vmul.f32 -1.442695, %v477_v42 }
 0x718   :  { %764 = vpow2.f32 %v729_v17 }
 0x71e   :  { %v765_v19 = vpop.eup %764 }
 0x71f   :  { %v481_v43 = vadd.f32 1.0, %v765_v19 }
 0x721   :  { %766 = vrcp.f32 %v481_v43  ;;  %v493_v23 = vand.u32 2147483648, %v481_v43  ;;  %v491_v25 = vand.u32 2147483647, %v481_v43  ;;  %vm487_vm4 = vweird.f32 %v481_v43 }
 0x723   :  { %v494_v55 = vor.u32 1.1754944e-38, %v493_v23  ;;  %vm492_vm6 = vcmp.eq.f32.partialorder %v491_v25, 8.507059e+37 }
 0x727   :  { %v767_v20 = vpop.eup %766 }
 0x728   :  { %v483_v22 = vmul.f32 %v767_v20, %v481_v43  ;;  %vm488_vm3 = vweird.f32 %v767_v20 }
 0x729   :  { %vm489_vm5 = vmor %vm487_vm4, %vm488_vm3 }
 0x72a   :  { %v484_v46 = vsub.f32 1.0, %v483_v22 }
 0x72c   :  { %v485_v39 = vmul.f32 %v767_v20, %v484_v46 }
 0x72e   :  { %v486_v49 = vadd.f32 %v767_v20, %v485_v39 }
 0x730   :  { %v490_v58 = vsel %vm489_vm5, %v767_v20, %v486_v49 }
 0x731   :  { %v495_v44 = vsel %vm492_vm6, %v494_v55, %v490_v58 }
 0x732   :  { %v497_v1 = vmul.f32 %v495_v44, %v475_v40  ;;  %v500_v6 = vsub.f32 1.0, %v495_v44  ;;  %v506_v45 = vmul.f32 %v495_v44, %v1209_v8 }
 0x734   :  { %v498_v3 = vadd.f32 %v497_v1, %v435_v0 }
 0x736   :  { %768 = vtanh.f32 %v498_v3 }
 0x73c   :  { %v769_v5 = vpop.eup %768 }
 0x73d   :  { %502 = vrot.lane.b32.xlu0 %v769_v5, %s782_s1 }
 0x7af   :  { %v503_v7 = vpop.permute.xlu0 %502 }
 0x7b0   :  { %v505_v47 = vmul.f32 %v503_v7, %v500_v6 }
 0x7b2   :  { %v1251_v48 = vadd.f32 %v506_v45, %v505_v47 }
 0x7b4   :  { %509 = vrot.lane.b32.xlu2 %v1251_v48, %s782_s1 }
 0x80e   :  { %v510_v50 = vpop.permute.xlu2 %509 }
 0x80f   :  { %730 = vmatmul.msk.f32.vlgmr.msra.gmra.mxu2 %vm88_vm0, %v510_v50  ;;  %733 = vmatmul.msk.f32.vlgmr.msrb.gmra.mxu1 %vm88_vm0, %v510_v50 }
 0x817   :  { %734 = vmatmul.msk.f32.vlgmr.msrb.gmra.mxu2 %vm88_vm0, %v510_v50 }
 0x88c   :  { %v655_v40 = vpop.f32.mrf.mxu1 }
 0x88d   :  { %v656_v58 = vadd.f32 %v655_v40, %v1196_v2 }
 0x892   :  { %v530_v51 = vpop.f32.mrf.mxu2 }
 0x893   :  { %v531_v53 = vadd.f32 %v896_v9, %v530_v51 }
 0x895   :  { %v533_v56 = vmul.f32 %v901_v10, %v531_v53 }
 0x897   :  { %v534_v8 = vsel %vm116_vm1, %v533_v56, 0.0 }
 0x898   :  { %535 = vadd.xlane.f32.xlu2 %v534_v8 }
 0x89a   :  { %v675_v53 = vpop.f32.mrf.mxu2 }
 0x90b   :  { %v536_v57 = vpop.xlane.xlu2 %535 }
 0x90c   :  { %v537_v59 = vadd.f32 %v536_v57, %v909_v15 }
 0x90e   :  { %770 = vtanh.f32 %v537_v59 }
 0x914   :  { %v771_v60 = vpop.eup %770 }
 0x915   :  { %v539_v61 = vsel %vm122_vm2, %v771_v60, -inf }
 0x916   :  { %540 = vmax.xlane.f32.xlu0 %v539_v61 }
 0x989   :  { %v541_v63 = vpop.xlane.xlu0 %540 }
 0x98a   :  { %v542_v11 = vsub.f32 %v771_v60, %v541_v63 }
 0x98c   :  { %v543_v12 = vmul.f32 1.442695, %v542_v11 }
 0x98e   :  { %772 = vpow2.f32 %v543_v12 }
 0x994   :  { %v773_v14 = vpop.eup %772 }
 0x995   :  { %v545_v9 = vsel %vm122_vm2, %v773_v14, 0.0 }
 0x996   :  { %546 = vadd.xlane.f32.xlu1 %v545_v9 }
 0xa09   :  { %v547_v10 = vpop.xlane.xlu1 %546 }
 0xa0a   :  { %774 = vrcp.f32 %v547_v10  ;;  %v559_v28 = vand.u32 2147483648, %v547_v10  ;;  %v557_v29 = vand.u32 2147483647, %v547_v10  ;;  %vm553_vm9 = vweird.f32 %v547_v10 }
 0xa0c   :  { %v560_v31 = vor.u32 1.1754944e-38, %v559_v28  ;;  %vm558_vm11 = vcmp.eq.f32.partialorder %v557_v29, 8.507059e+37 }
 0xa10   :  { %v775_v18 = vpop.eup %774 }
 0xa11   :  { %v549_v21 = vmul.f32 %v775_v18, %v547_v10  ;;  %vm554_vm8 = vweird.f32 %v775_v18 }
 0xa12   :  { %vm555_vm10 = vmor %vm553_vm9, %vm554_vm8 }
 0xa13   :  { %v550_v24 = vsub.f32 1.0, %v549_v21 }
 0xa15   :  { %v551_v15 = vmul.f32 %v775_v18, %v550_v24 }
 0xa17   :  { %v552_v30 = vadd.f32 %v775_v18, %v551_v15 }
 0xa19   :  { %v556_v32 = vsel %vm555_vm10, %v775_v18, %v552_v30 }
 0xa1a   :  { %v561_v33 = vsel %vm558_vm11, %v560_v31, %v556_v32 }
 0xa1b   :  { %v562_v34 = vmul.f32 %v773_v14, %v561_v33 }
 0xa1d   :  { %v570_v35 = vperm.slane %v562_v34, 1  ;;  %v563_v36 = vperm.slane %v562_v34, 0 }
 0xa1f   :  { %575 = vperm.xlu0 %743, %v570_v35   ;;  %568 = vperm.xlu2 %742, %v563_v36  }
 0xa79   :  { %v569_v37 = vpop.permute.xlu2 %568 }
 0xa7a   :  { %v577_v38 = vmul.f32 %v1129_v26, %v569_v37 }
 0xa7c   :  { %v579_v41 = vsel %vm88_vm0, %v577_v38, 0.0 }
 0xa7d   :  { %v580_v16 = vrot.slane %v579_v41, 4 }
 0xa7f   :  { %v581_v42 = vadd.f32 %v580_v16, %v579_v41 }
 0xa81   :  { %v582_v43 = vrot.slane %v581_v42, 2 }
 0xa83   :  { %v583_v46 = vadd.f32 %v582_v43, %v581_v42 }
 0xa85   :  { %v584_v25 = vrot.slane %v583_v46, 1 }
 0xa87   :  { %v585_v52 = vadd.f32 %v584_v25, %v583_v46 }
 0xa91   :  { %v576_v17 = vpop.permute.xlu0 %575 }
 0xa92   :  { %v578_v19 = vmul.f32 %v1063_v13, %v576_v17 }
 0xa94   :  { %v586_v20 = vsel %vm88_vm0, %v578_v19, 0.0 }
 0xa95   :  { %v587_v22 = vrot.slane %v586_v20, 4 }
 0xa97   :  { %v588_v23 = vadd.f32 %v587_v22, %v586_v20 }
 0xa99   :  { %v589_v39 = vrot.slane %v588_v23, 2 }
 0xa9b   :  { %v590_v27 = vadd.f32 %v589_v39, %v588_v23 }
 0xa9d   :  { %v591_v49 = vrot.slane %v590_v27, 1 }
 0xa9f   :  { %v592_v55 = vadd.f32 %v591_v49, %v590_v27 }
 0xaa1   :  { %v595_v26 = vsel %vm184_vm7, %v592_v55, %v585_v52 }
 0xaa2   :  { %731 = vmatmul.msk.f32.vlgmr.msra.gmra.mxu3 %vm88_vm0, %v595_v26  ;;  %732 = vmatmul.msk.f32.vlgmr.msrb.gmra.mxu0 %vm88_vm0, %v595_v26 }
 0xb1f   :  { %v635_v8 = vpop.f32.mrf.mxu0 }
 0xb20   :  { %v636_v60 = vadd.f32 %v635_v8, %v1204_v62 }
 0xb25   :  { %v615_v13 = vpop.f32.mrf.mxu3 }
 0xb26   :  { %v616_v44 = vadd.f32 %v615_v13, %v1198_v4  ;;  %v676_v4 = vadd.f32 %v675_v53, %v1202_v54 }
 0xb28   :  { %v678_v0 = vadd.f32 %v656_v58, %v616_v44 }
 0xb2a   :  { %v735_v1 = vmul.f32 -1.442695, %v678_v0 }
 0xb2c   :  { %776 = vpow2.f32 %v735_v1 }
 0xb32   :  { %v777_v3 = vpop.eup %776 }
 0xb33   :  { %v682_v5 = vadd.f32 1.0, %v777_v3 }
 0xb35   :  { %778 = vrcp.f32 %v682_v5  ;;  %v694_v47 = vand.u32 2147483648, %v682_v5  ;;  %v692_v51 = vand.u32 2147483647, %v682_v5  ;;  %vm688_vm0 = vweird.f32 %v682_v5 }
 0xb37   :  { %v695_v2 = vor.u32 1.1754944e-38, %v694_v47  ;;  %vm693_vm12 = vcmp.eq.f32.partialorder %v692_v51, 8.507059e+37 }
 0xb3b   :  { %v779_v6 = vpop.eup %778 }
 0xb3c   :  { %v684_v7 = vmul.f32 %v779_v6, %v682_v5  ;;  %vm689_vm2 = vweird.f32 %v779_v6 }
 0xb3d   :  { %vm690_vm7 = vmor %vm688_vm0, %vm689_vm2 }
 0xb3e   :  { %v685_v45 = vsub.f32 1.0, %v684_v7 }
 0xb40   :  { %v686_v50 = vmul.f32 %v779_v6, %v685_v45 }
 0xb42   :  { %v687_v56 = vadd.f32 %v779_v6, %v686_v50 }
 0xb44   :  { %v691_v57 = vsel %vm690_vm7, %v779_v6, %v687_v56 }
 0xb45   :  { %v696_v59 = vsel %vm693_vm12, %v695_v2, %v691_v57 }
 0xb46   :  { %v698_v61 = vmul.f32 %v696_v59, %v676_v4  ;;  %v701_v12 = vsub.f32 1.0, %v696_v59  ;;  %v707_v9 = vmul.f32 %v696_v59, %v1251_v48 }
 0xb48   :  { %v699_v63 = vadd.f32 %v698_v61, %v636_v60 }
 0xb4a   :  { %780 = vtanh.f32 %v699_v63 }
 0xb50   :  { %v781_v11 = vpop.eup %780 }
 0xb51   :  { %703 = vrot.lane.b32.xlu1 %v781_v11, %s782_s1 }
 0xbc3   :  { %v704_v14 = vpop.permute.xlu1 %703 }
 0xbc4   :  { %v706_v10 = vmul.f32 %v704_v14, %v701_v12 }
 0xbc6   :  { %v708_v18 = vadd.f32 %v707_v9, %v706_v10 }
 0xbc8   :  { %710 = vrot.lane.b32.xlu2 %v708_v18, %s782_s1 }
 0xc22   :  { %v711_v54 = vpop.permute.xlu2 %710 }
 0xc23   :  { %713 = vst.msk [vmem:[%s1292_s10] sm:$0x3] %vm116_vm1, %v711_v54 }

</bundles_post_ra>
